<compile_context>
chip_gen: v5e
topology: v5e:2x2
jax: 0.10.0
libtpu: 0.0.40
codegen_flags: <defaults>
</compile_context>

<pallas_src>
import functools
import sys

import jax
import jax.numpy as jnp
from jax.experimental import pallas as pl
from jax.experimental.pallas import tpu as pltpu


_MAX_TILE_IN_BYTES = 2 << 20    # ~2 MiB unpadded input per grid step (mem-bound sweet spot)
_MIN_TILE_IN_BYTES = 256 << 10  # don't shred tiny inputs into sub-256 KiB steps
_VMEM_TILE_BUDGET = 12 << 20    # padded per-step footprint budget (buffers + temps)


def _round_up(x, m):
    return ((x + m - 1) // m) * m


# ----------------------------- optimized kernel -----------------------------
def _std_kernel(x_ref, o_ref, *, scale):
    """x_ref: (cblk, H, W)  ->  o_ref: (cblk, scale*scale, H//scale, W//scale)."""
    cblk, H, W = x_ref.shape
    Ho, Wo = H // scale, W // scale
    for i in range(scale):                              # static unroll, scale is compile-time
        # Row (H) de-interleave: sublane-strided read of rows i, i+s, i+2s, ...
        xi = x_ref[:, pl.ds(i, Ho, stride=scale), :]    # (cblk, Ho, W)
        # Column (W) de-interleave — the only cross-lane (XLU) work in the kernel.
        yi = xi.reshape(cblk, Ho, Wo, scale)
        yi = jnp.transpose(yi, (0, 3, 1, 2))            # (cblk, scale, Ho, Wo)
        # Static-offset slab store; output channel index is i*scale + j, which
        # matches the torch permute(0, 1, 3, 5, 2, 4) ordering.
        o_ref[:, i * scale:(i + 1) * scale, :, :] = yi
    # TODO(synk): on v7x (3.2 TB/s HBM, unchanged XLU) replace the
    # reshape+transpose W de-interleave with a pltpu.bitcast pair-pack
    # (bf16/int8, scale=2/4) or a single per-vreg lane permute for f32 so the
    # XLU never becomes the binding slot; on v5e/v6e it hides under HBM.


def _vmem_capacity_bytes():
    try:
        return int(pltpu.get_tpu_info().vmem_capacity_bytes)
    except Exception:  # noqa: BLE001 - conservative default (v7x per-TC VMEM)
        return 64 << 20


def _choose_cblk(bc, in_bytes_pc, padded_step_bytes_pc,
                 max_tile_bytes, vmem_budget_bytes, min_tile_bytes):
    """Fused-channel block size.

    Hard caps: ~2 MiB unpadded input per step and a padded per-step VMEM
    budget.  Soft targets: >= 8 grid steps while tiles stay >= 256 KiB
    (pipelining), else >= 2 steps (v7x megacore).  Prefers an exact divisor of
    bc close below the target so no padding is needed; otherwise the caller
    pads bc up to a multiple of the returned block.
    """
    cap = bc
    cap = min(cap, max(1, max_tile_bytes // max(in_bytes_pc, 1)))
    cap = min(cap, max(1, vmem_budget_bytes // max(padded_step_bytes_pc, 1)))
    cap = max(cap, 1)

    cblk = cap
    c8 = max(1, bc // 8)
    if c8 * in_bytes_pc >= min_tile_bytes:
        cblk = min(cblk, c8)                      # >= 8 steps with healthy tiles
    elif bc >= 2:
        cblk = min(cblk, max(1, bc // 2))         # at least 2 steps for megacore

    lo = max(1, (cblk * 3) // 4)
    for d in range(cblk, lo - 1, -1):             # prefer an exact divisor (no padding)
        if bc % d == 0:
            return d
    return cblk                                   # ragged: caller pads BC


def _run_fast(x_flat, scale, cblk, grid, vmem_limit, use_buffered):
    BCp, H, W = x_flat.shape
    Ho, Wo = H // scale, W // scale
    itemsize = jnp.dtype(x_flat.dtype).itemsize

    if use_buffered:
        in_spec = pl.BlockSpec((cblk, H, W), lambda g: (g, 0, 0),
                               pipeline_mode=pl.Buffered(3))
    else:
        in_spec = pl.BlockSpec((cblk, H, W), lambda g: (g, 0, 0))

    kernel = functools.partial(_std_kernel, scale=scale)
    return pl.pallas_call(
        kernel,
        out_shape=jax.ShapeDtypeStruct((BCp, scale * scale, Ho, Wo), x_flat.dtype),
        grid=(grid,),
        in_specs=[in_spec],
        out_specs=pl.BlockSpec((cblk, scale * scale, Ho, Wo),
                               lambda g: (g, 0, 0, 0)),
        compiler_params=pltpu.CompilerParams(
            dimension_semantics=("parallel",),
            vmem_limit_bytes=vmem_limit,
        ),
        cost_estimate=pl.CostEstimate(
            flops=0, transcendentals=0,
            bytes_accessed=2 * BCp * H * W * itemsize),
    )(x_flat)


# ------------------------- legacy (fallback) kernel --------------------------
def _std_kernel_legacy(x_ref, o_ref, *, scale):
    x = x_ref[0, 0]                       # (H, W)
    H, W = x.shape
    Ho, Wo = H // scale, W // scale
    y = x.reshape(Ho, scale, Wo, scale)
    y = jnp.transpose(y, (1, 3, 0, 2))
    o_ref[0] = y.reshape(scale * scale, Ho, Wo)


def _std_pallas_legacy(x, scale):
    B, C, H, W = x.shape
    Ho, Wo = H // scale, W // scale
    kernel = functools.partial(_std_kernel_legacy, scale=scale)
    return pl.pallas_call(
        kernel,
        out_shape=jax.ShapeDtypeStruct((B, C * scale * scale, Ho, Wo), x.dtype),
        grid=(B, C),
        in_specs=[pl.BlockSpec((1, 1, H, W), lambda b, c: (b, c, 0, 0))],
        out_specs=pl.BlockSpec((1, scale * scale, Ho, Wo),
                               lambda b, c: (b, c, 0, 0)),
        compiler_params=pltpu.CompilerParams(
            dimension_semantics=("parallel", "parallel")),
    )(x)


# --------------------------------- wrapper -----------------------------------
def std_pallas(x, scale):
    """Space-to-depth identical to the PyTorch STD module (NCHW)."""
    B, C, H, W = x.shape
    assert H % scale == 0 and W % scale == 0, (H, W, scale)
    Ho, Wo = H // scale, W // scale
    BC = B * C
    itemsize = jnp.dtype(x.dtype).itemsize

    cap = _vmem_capacity_bytes()
    # Padded (vreg-layout) per-fused-channel byte estimates for VMEM sizing.
    in_pad_pc = _round_up(H, 8) * _round_up(W, 128) * itemsize
    out_pad_pc = scale * scale * _round_up(Ho, 8) * _round_up(Wo, 128) * itemsize
    tmp_pc = 3 * _round_up(Ho, 8) * _round_up(W, 128) * itemsize   # xi/yi temporaries
    step_pc = 3 * in_pad_pc + 2 * out_pad_pc + tmp_pc              # 3x in, 2x out buffers

    tile_budget = min(_VMEM_TILE_BUDGET, cap // 4)
    cblk = _choose_cblk(BC, H * W * itemsize, step_pc,
                        max_tile_bytes=_MAX_TILE_IN_BYTES,
                        vmem_budget_bytes=tile_budget,
                        min_tile_bytes=_MIN_TILE_IN_BYTES)
    grid = pl.cdiv(BC, cblk)
    BCp = grid * cblk

    # Scoped-VMEM limit: chosen tiles + temporaries + headroom, capped well
    # below physical VMEM (64 MiB/TC on v7x, 128 MiB on v5e/v6e).
    needed = cblk * step_pc + (4 << 20)
    vmem_limit = int(min(max(32 << 20, needed), (cap * 3) // 4))

    x_flat = x.reshape(BC, H, W)                 # contiguous -> free
    if BCp != BC:                                # ragged B*C: pad fused channels
        x_flat = jnp.pad(x_flat, ((0, BCp - BC), (0, 0), (0, 0)))

    out4 = None
    last_err = None
    for use_buffered in (True, False):
        try:
            out4 = _run_fast(x_flat, scale, cblk, grid, vmem_limit, use_buffered)
            break
        except Exception as e:  # noqa: BLE001 - logged + retried, never silent
            last_err = e
            print("std_pallas: fast path (buffer depth {}) failed: {!r}".format(
                3 if use_buffered else 2, e), file=sys.stderr)

    if out4 is None:
        print("std_pallas: falling back to legacy per-channel kernel "
              "(last error: {!r})".format(last_err), file=sys.stderr)
        return _std_pallas_legacy(x, scale)

    if BCp != BC:
        out4 = out4[:BC]
    # (BC, s*s, Ho, Wo) -> (B, C*s*s, Ho, Wo): only leading dims are merged and
    # the minor (Ho, Wo) tiling is unchanged, so this reshape is layout-free.
    return out4.reshape(B, C * scale * scale, Ho, Wo)


def std_reference(x, scale):
    """Pure-JAX reference replicating the torch view/permute/view chain."""
    B, C, H, W = x.shape
    y = x.reshape(B, C, H // scale, scale, W // scale, scale)
    y = jnp.transpose(y, (0, 1, 3, 5, 2, 4))
    return y.reshape(B, C * scale * scale, H // scale, W // scale)


if __name__ == "__main__":
    key = jax.random.PRNGKey(0)
    cases = [
        ((2, 4, 16, 16), 2, jnp.float32),   # primary shape (module spec check)
        ((2, 8, 32, 32), 2, jnp.float32),   # multi-step parallel grid
        ((7, 1, 16, 16), 2, jnp.float32),   # ragged B*C -> padded grid path
        ((1, 3, 8, 8), 4, jnp.float32),     # scale = 4
        ((2, 4, 16, 16), 2, jnp.bfloat16),  # packed-dtype path
    ]
    for idx, (shape, scale, dtype) in enumerate(cases):
        k = jax.random.fold_in(key, idx)
        x = jax.random.normal(k, shape, dtype=jnp.float32).astype(dtype)
        out = jax.block_until_ready(std_pallas(x, scale))
        ref = std_reference(x, scale)
        assert out.shape == ref.shape, (shape, out.shape, ref.shape)
        assert out.dtype == ref.dtype, (out.dtype, ref.dtype)
        assert jnp.array_equal(out, ref), f"mismatch vs reference for {shape}, scale={scale}, {dtype}"
    print("KERNEL_OK")
</pallas_src>

<mosaic_0001>
module attributes {stable_mosaic.version = 11 : i64} {
  func.func @_std_kernel(%arg0: i32, %arg1: memref<4x16x16xf32, #tpu.memory_space<vmem>>, %arg2: memref<4x4x8x8xf32, #tpu.memory_space<vmem>>) attributes {dimension_semantics = [#tpu.dimension_semantics<parallel>], iteration_bounds = array<i64: 2>, scalar_prefetch = 0 : i64, scratch_operands = 0 : i64, tpu.core_type = #tpu.core_type<tc>, window_params = [{transform_indices = @transform_0, window_bounds = array<i64: 4, 16, 16>}, {transform_indices = @transform_1, window_bounds = array<i64: 4, 4, 8, 8>}]} {
    %c0 = arith.constant 0 : index
    %c0_0 = arith.constant 0 : index
    %c0_1 = arith.constant 0 : index
    %0 = tpu.strided_load %arg1[%c0, %c0_0, %c0_1] {strides = array<i32: 1, 2, 1>} : memref<4x16x16xf32, #tpu.memory_space<vmem>>, vector<4x8x16xf32>
    %1 = vector.shape_cast %0 : vector<4x8x16xf32> to vector<4x8x8x2xf32>
    %2 = tpu.transpose %1, [0, 3, 1, 2] : vector<4x8x8x2xf32> -> vector<4x2x8x8xf32>
    %c0_2 = arith.constant 0 : index
    %c0_3 = arith.constant 0 : index
    %c0_4 = arith.constant 0 : index
    %c0_5 = arith.constant 0 : index
    %3 = vector.load %arg2[%c0_2, %c0_3, %c0_4, %c0_5] : memref<4x4x8x8xf32, #tpu.memory_space<vmem>>, vector<4x2x8x8xf32>
    tpu.vector_store %arg2[%c0_2, %c0_3, %c0_4, %c0_5], %2 {strides = array<i32>} : memref<4x4x8x8xf32, #tpu.memory_space<vmem>>, vector<4x2x8x8xf32>,
    %c0_6 = arith.constant 0 : index
    %c1 = arith.constant 1 : index
    %c0_7 = arith.constant 0 : index
    %4 = tpu.strided_load %arg1[%c0_6, %c1, %c0_7] {strides = array<i32: 1, 2, 1>} : memref<4x16x16xf32, #tpu.memory_space<vmem>>, vector<4x8x16xf32>
    %5 = vector.shape_cast %4 : vector<4x8x16xf32> to vector<4x8x8x2xf32>
    %6 = tpu.transpose %5, [0, 3, 1, 2] : vector<4x8x8x2xf32> -> vector<4x2x8x8xf32>
    %c0_8 = arith.constant 0 : index
    %c2 = arith.constant 2 : index
    %c0_9 = arith.constant 0 : index
    %c0_10 = arith.constant 0 : index
    %7 = vector.load %arg2[%c0_8, %c2, %c0_9, %c0_10] : memref<4x4x8x8xf32, #tpu.memory_space<vmem>>, vector<4x2x8x8xf32>
    tpu.vector_store %arg2[%c0_8, %c2, %c0_9, %c0_10], %6 {strides = array<i32>} : memref<4x4x8x8xf32, #tpu.memory_space<vmem>>, vector<4x2x8x8xf32>,
    return
  }
  func.func @transform_0(%arg0: i32) -> (i32, i32, i32) {
    %c0_i32 = arith.constant 0 : i32
    %c0_i32_0 = arith.constant 0 : i32
    %c0_i32_1 = arith.constant 0 : i32
    return %arg0, %c0_i32, %c0_i32_0 : i32, i32, i32
  }
  func.func @transform_1(%arg0: i32) -> (i32, i32, i32, i32) {
    %c0_i32 = arith.constant 0 : i32
    %c0_i32_0 = arith.constant 0 : i32
    %c0_i32_1 = arith.constant 0 : i32
    %c0_i32_2 = arith.constant 0 : i32
    return %arg0, %c0_i32, %c0_i32_0, %c0_i32_1 : i32, i32, i32, i32
  }
}

module attributes {stable_mosaic.version = 11 : i64} {
  func.func @_std_kernel_legacy(%arg0: i32, %arg1: i32, %arg2: memref<1x1x16x16xf32, #tpu.memory_space<vmem>>, %arg3: memref<1x4x8x8xf32, #tpu.memory_space<vmem>>) attributes {dimension_semantics = [#tpu.dimension_semantics<parallel>, #tpu.dimension_semantics<parallel>], iteration_bounds = array<i64: 2, 4>, scalar_prefetch = 0 : i64, scratch_operands = 0 : i64, tpu.core_type = #tpu.core_type<tc>, window_params = [{transform_indices = @transform_0, window_bounds = array<i64: 1, 1, 16, 16>}, {transform_indices = @transform_1, window_bounds = array<i64: 1, 4, 8, 8>}]} {
    %c0 = arith.constant 0 : index
    %c0_0 = arith.constant 0 : index
    %c0_1 = arith.constant 0 : index
    %c0_2 = arith.constant 0 : index
    %0 = vector.load %arg2[%c0, %c0_0, %c0_1, %c0_2] : memref<1x1x16x16xf32, #tpu.memory_space<vmem>>, vector<1x1x16x16xf32>
    %1 = vector.shape_cast %0 : vector<1x1x16x16xf32> to vector<16x16xf32>
    %2 = vector.shape_cast %1 : vector<16x16xf32> to vector<8x2x8x2xf32>
    %3 = tpu.transpose %2, [1, 3, 0, 2] : vector<8x2x8x2xf32> -> vector<2x2x8x8xf32>
    %4 = vector.shape_cast %3 : vector<2x2x8x8xf32> to vector<4x8x8xf32>
    %c0_3 = arith.constant 0 : index
    %c0_4 = arith.constant 0 : index
    %c0_5 = arith.constant 0 : index
    %c0_6 = arith.constant 0 : index
    %5 = vector.load %arg3[%c0_3, %c0_4, %c0_5, %c0_6] : memref<1x4x8x8xf32, #tpu.memory_space<vmem>>, vector<1x4x8x8xf32>
    %6 = vector.shape_cast %5 : vector<1x4x8x8xf32> to vector<4x8x8xf32>
    %7 = vector.shape_cast %4 : vector<4x8x8xf32> to vector<1x4x8x8xf32>
    tpu.vector_store %arg3[%c0_3, %c0_4, %c0_5, %c0_6], %7 {strides = array<i32>} : memref<1x4x8x8xf32, #tpu.memory_space<vmem>>, vector<1x4x8x8xf32>,
    return
  }
  func.func @transform_0(%arg0: i32, %arg1: i32) -> (i32, i32, i32, i32) {
    %c0_i32 = arith.constant 0 : i32
    %c0_i32_0 = arith.constant 0 : i32
    %c0_i32_1 = arith.constant 0 : i32
    return %arg0, %arg1, %c0_i32, %c0_i32_0 : i32, i32, i32, i32
  }
  func.func @transform_1(%arg0: i32, %arg1: i32) -> (i32, i32, i32, i32) {
    %c0_i32 = arith.constant 0 : i32
    %c0_i32_0 = arith.constant 0 : i32
    %c0_i32_1 = arith.constant 0 : i32
    return %arg0, %arg1, %c0_i32, %c0_i32_0 : i32, i32, i32, i32
  }
}

</mosaic_0001>

<bundles_post_ra>
// kernel: tpu_custom_call.1
= control target key start
LH: loop header
LB: loop body
LE: loop exit
PB: predicated region body
PF: predicated region fallthrough
CT: control target
= control target key end

     0   :  { %6 = vsyncpa [#allocation3], 0  ;;  %s5175_s0 = inlined_call_operand.hbm [shape: f32[8,16,16], index: 0, kind: input, shape index: {}]   ;;  %s5176_s1 = inlined_call_operand.hbm [shape: f32[8,4,8,8], index: 1, kind: output, shape index: {}]  }
   0x1   :  { %8 = vsyncpa [#allocation3 + $0x1], 0 }
   0x2   :  { %9 = vsyncpa [#allocation4], 0 }
   0x3   :  { %11 = vsyncpa [#allocation4 + $0x1], 0  ;;  %s3920_s6 = smov 0   ;;  %s3922_s7 = smov 0  }
   0x4   :  { %s3924_s8 = smov 0   ;;  %s3926_s9 = smov 0  }
   0x5 LB: > { %s3941_s10 = sadd.s32 4294967295, %s3895_s9   ;;  %s3704_s11 = sadd.s32 4294967294, %s3895_s9   ;;  %s3895_s9 = sphi %s3926_s9, %s5200_s9   ;;  %s3891_s8 = sphi %s3924_s8, %s5199_s8   ;;  %s3887_s7 = sphi %s3922_s7, %s5198_s7   ;;  %s3883_s6 = sphi %s3920_s6, %s5197_s6  }
   0x6   : > { %s3945_s12 = sadd.s32 1, %s3895_s9   ;;  %s24_s13 = sadd.s32 1, %s3891_s8 }
   0x7   : > { %s21_s14 = ssub.s32 %s3895_s9, %s3945_s12  ;;  %p31_p0 = scmp.ne.s32.totalorder %s3891_s8, %s3887_s7 }
   0x8   : > { %p22_p1 = scmp.eq.s32.totalorder %s21_s14, 0  ;;  %p32_p2 = scmp.eq.s32.totalorder %s3895_s9, 0 }
   0x9   : > { %p37_p3 = scmp.ne.s32.totalorder %s3887_s7, %s3883_s6  ;;  %p38_p4 = scmp.eq.s32.totalorder %s3941_s10, 0 }
   0xa   : > { %s3957_s15 = scalar_select %p22_p1, %s3891_s8, %s24_s13  }
   0xb   : > { %p3959_p5 = por %p32_p2, %p31_p0  ;;  %p3963_p6 = por %p38_p4, %p37_p3 }
   0xc   : > { %p61_p7 = scmp.eq.s32.totalorder %s3941_s10, 1  ;;  %p67_p8 = scmp.eq.s32.totalorder %s3704_s11, 1 }
   0xd   : > { %p3751_p10 = scmp.lt.s32.totalorder %s3895_s9, 2  ;;  %s87_s20 = sand.u32 1, %s3891_s8  }
   0xe   : > { %p3970_p11 = por %p61_p7, %p31_p0  ;;  %p3974_p12 = por %p67_p8, %p37_p3 }
   0xf   : > { %s3736_s21 = sshll.u32 %s3895_s9, 6  ;;  %s3707_s22 = sshll.u32 %s87_s20, 6 }
  0x10   : > { %s97_s25 = scalar_lea.hbm %s5175_s0, %s3736_s21  ;;  %s91_s27 = scalar_lea.vmem [#allocation2], %s3707_s22 }
  0x11   : > { %s98_s26 = sshll.u32 %s97_s25, 4  ;;  %s100_s28 = sshll.u32 %s91_s27, 4  ;;  %s99_s26 = int_to_ptr.hbm [resolvable:$true] %s98_s26  ;;  %s101_s28 = int_to_ptr.vmem [resolvable:$true] %s100_s28 }
  0x12   : > { %p3985_p13 = pnand %p3751_p10, %p3959_p5  ;;  %p3711_p0 = scmp.ge.s32.totalorder %s3895_s9, 1 }
  0x13   : > { %p108_p1 = scmp.lt.s32.totalorder %s3895_s9, 3  ;;  %s88_s30 = scalar_lea.sflag [#allocation3], %s87_s20 }
  0x14   : > { %s3799_s2 = sshra.s32 %s99_s26, 4  ;;  %p3803_p3 = pneg %p3985_p13  ;;  %s3800_s2 = int_to_ptr.hbm [resolvable:$true] %s3799_s2 }
  0x15   : > { %s3801_s3 = scalar_lea.hbm %s3800_s2, 64  ;;  %s3806_s11 = scalar_lea.hbm %s5175_s0, 128 }
  0x16   : > { %p3802_p2 = scmp.ne.s32.totalorder %s3800_s2, %s3801_s3  ;;  %p3807_p5 = scmp.lt.s32.totalorder %s3800_s2, %s5175_s0 }
  0x17   : > { %p3808_p8 = scmp.lt.s32.totalorder %s3806_s11, %s3801_s3 }
  0x18   : > { %p3804_p4 = pnand %p3803_p3, %p3802_p2 }
  0x19   : > { %p3809_p10 = por %p3808_p8, %p3807_p5 }
  0x1a   : > { %p3805_p7 = pneg %p3804_p4 }
  0x1c   : > { %p3810_p9 = pnand %p3809_p10, %p3805_p7 }
  0x1e   : > { %3813 = shalt.err (!%p3810_p9)
}
  0x1f   : > { %s3897_s16 = smov 128   ;;  %s3898_s20 = smov 8  }
  0x20   : > { %3746 = dma.hbm_to_vmem [thread:$0]  (!%p3985_p13), %s99_s26, 1024, %s101_s28, %s88_s30, %s3897_s16, %s3897_s16, %s3898_s20  }
  0x21   : > { %p109_p2 = pnand %p3711_p0, %p108_p1 }
  0x22   : > { %s4006_s21 = sand.u32 (!%p109_p2), 1, %s3887_s7  }
  0x23   : > { %112 = sbr.rel (%p109_p2) target bundleno = 588 (0x24c), region = 24  ;;  %s3712_s22 = sshll.u32 (!%p109_p2), %s4006_s21, 6 }
  0x24   : > { %s115_s23 = scalar_lea.sflag (!%p109_p2), [#allocation3], %s4006_s21  ;;  %s4010_s24 = scalar_lea.vmem (!%p109_p2), [#allocation2], %s3712_s22 }
  0x28   : > { %3874 = dma.done.wait (%p3963_p6), %s115_s23, 1024  }
  0x29   : > { %3876 = vsyncadd (%p3963_p6), %s115_s23, 4294966272  ;;  %v4017_v0 = vld [vmem:[%s4010_s24 + $0x20] ss:$2 sm:$0xff]  ;;  %s3899_s25 = smov 126   ;;  %s3900_s26 = smov 124   ;;  %vm236_vm0 = vcmask 1047556  }
  0x2a   : > { %v4020_v1 = vld [vmem:[%s4010_s24] ss:$2 sm:$0xff]  ;;  %155 = vrot.lane.b32.xlu1 %v4017_v0, %s3899_s25  ;;  %v4029_v2 = vld [vmem:[%s4010_s24 + $0x30] ss:$2 sm:$0xff]  ;;  %s3901_s17 = smov 122   ;;  %s3902_s27 = smov 120  }
  0x2b   : > { %151 = vrot.lane.b32.xlu0 %v4020_v1, %s3899_s25  ;;  %163 = vrot.lane.b32.xlu2 %v4020_v1, %s3900_s26  ;;  %v4032_v3 = vld [vmem:[%s4010_s24 + $0x10] ss:$2 sm:$0xff]  ;;  %s3903_s28 = smov 118   ;;  %s3904_s29 = smov 116   ;;  %v4083_v4 = vld [vmem:[%s4010_s24 + $0x21] ss:$2 sm:$0xff] }
  0x2c   : > { %s3905_s30 = smov 114   ;;  %v4086_v5 = vld [vmem:[%s4010_s24 + $0x1] ss:$2 sm:$0xff]  ;;  %v4095_v6 = vld [vmem:[%s4010_s24 + $0x31] ss:$2 sm:$0xff]  ;;  %v574_v25 = vrot.slane %v4029_v2, 4 }
  0x2d   : > { %v4098_v7 = vld [vmem:[%s4010_s24 + $0x11] ss:$2 sm:$0xff]  ;;  %v3906_v15 = vmov 1983009808   ;;  %v350_v27 = vrot.slane %v4032_v3, 4  ;;  %v462_v30 = vrot.slane %v4017_v0, 4 }
  0x2e   : > { %v241_v16 = vunpack.c.l.s4 %v3906_v15  ;;  %s3713_s2 = sshll.u32 %s4006_s21, 7  ;;  %vm1868_vm1 = vcmask 64512   ;;  %s3738_s4 = sshll.u32 %s3941_s10, 7 }
  0x2f   : > { %s5009_s3 = scalar_lea.vmem [#allocation5], %s3713_s2  ;;  %s3627_s13 = scalar_lea.hbm %s5176_s1, %s3738_s4 }
  0x30   : > { %v4147_v22 = vunpack.c.0.s8 %v241_v16  ;;  %s3628_s14 = sshll.u32 %s5009_s3, 4  ;;  %s3630_s10 = sshll.u32 %s3627_s13, 4  ;;  %s3629_s14 = int_to_ptr.vmem [resolvable:$true] %s3628_s14  ;;  %s3631_s10 = int_to_ptr.hbm [resolvable:$true] %s3630_s10 }
  0x31   : > { %s3615_s16 = scalar_lea.sflag [#allocation4], %s4006_s21  ;;  %s3843_s20 = sshra.s32 %s3631_s10, 4  ;;  %s3844_s20 = int_to_ptr.hbm [resolvable:$true] %s3843_s20 }
  0x32   : > { %157 = vrot.lane.b32.xlu1 %v4029_v2, %s3899_s25  ;;  %s3845_s22 = scalar_lea.hbm %s3844_s20, 128  ;;  %p3850_p0 = scmp.lt.s32.totalorder %s3844_s20, %s5176_s1 }
  0x33   : > { %153 = vrot.lane.b32.xlu0 %v4032_v3, %s3899_s25  ;;  %165 = vrot.lane.b32.xlu2 %v4032_v3, %s3900_s26  ;;  %p3846_p6 = scmp.ne.s32.totalorder %s3844_s20, %s3845_s22 }
  0x35   : > { %p3847_p9 = pnand %p3846_p6, %p3970_p11 }
  0x37   : > { %p3848_p13 = pneg %p3847_p9 }
  0x3a   : > { %169 = vrot.lane.b32.xlu1 %v4029_v2, %s3900_s26 }
  0x3b   : > { %167 = vrot.lane.b32.xlu0 %v4017_v0, %s3900_s26  ;;  %175 = vrot.lane.b32.xlu2 %v4020_v1, %s3901_s17 }
  0x42   : > { %179 = vrot.lane.b32.xlu1 %v4017_v0, %s3901_s17 }
  0x43   : > { %177 = vrot.lane.b32.xlu0 %v4032_v3, %s3901_s17  ;;  %181 = vrot.lane.b32.xlu2 %v4029_v2, %s3901_s17 }
  0x4a   : > { %189 = vrot.lane.b32.xlu1 %v4032_v3, %s3902_s27 }
  0x4b   : > { %187 = vrot.lane.b32.xlu0 %v4020_v1, %s3902_s27  ;;  %191 = vrot.lane.b32.xlu2 %v4017_v0, %s3902_s27 }
  0x52   : > { %199 = vrot.lane.b32.xlu1 %v4020_v1, %s3903_s28 }
  0x53   : > { %193 = vrot.lane.b32.xlu0 %v4029_v2, %s3902_s27  ;;  %201 = vrot.lane.b32.xlu2 %v4032_v3, %s3903_s28 }
  0x5a   : > { %205 = vrot.lane.b32.xlu1 %v4029_v2, %s3903_s28 }
  0x5b   : > { %203 = vrot.lane.b32.xlu0 %v4017_v0, %s3903_s28  ;;  %211 = vrot.lane.b32.xlu2 %v4020_v1, %s3904_s29 }
  0x62   : > { %215 = vrot.lane.b32.xlu1 %v4017_v0, %s3904_s29 }
  0x63   : > { %213 = vrot.lane.b32.xlu0 %v4032_v3, %s3904_s29  ;;  %217 = vrot.lane.b32.xlu2 %v4029_v2, %s3904_s29 }
  0x6a   : > { %225 = vrot.lane.b32.xlu1 %v4032_v3, %s3905_s30 }
  0x6b   : > { %223 = vrot.lane.b32.xlu0 %v4020_v1, %s3905_s30  ;;  %227 = vrot.lane.b32.xlu2 %v4017_v0, %s3905_s30 }
  0x72   : > { %1893 = vrot.lane.b32.xlu1 %v4083_v4, %s3899_s25 }
  0x73   : > { %229 = vrot.lane.b32.xlu0 %v4029_v2, %s3905_s30  ;;  %1889 = vrot.lane.b32.xlu2 %v4086_v5, %s3899_s25 }
  0x7a   : > { %1895 = vrot.lane.b32.xlu1 %v4095_v6, %s3899_s25 }
  0x7b   : > { %1891 = vrot.lane.b32.xlu0 %v4098_v7, %s3899_s25  ;;  %1903 = vrot.lane.b32.xlu2 %v4098_v7, %s3900_s26  ;;  %s3849_s25 = scalar_lea.hbm %s5176_s1, 256 }
  0x7c   : > { %p3851_p1 = scmp.lt.s32.totalorder %s3849_s25, %s3845_s22 }
  0x7e   : > { %p3852_p3 = por %p3851_p1, %p3850_p0 }
  0x80   : > { %p3853_p4 = pnand %p3852_p3, %p3848_p13 }
  0x82   : > { %1901 = vrot.lane.b32.xlu1 %v4086_v5, %s3900_s26 }
  0x83   : > { %1913 = vrot.lane.b32.xlu0 %v4086_v5, %s3901_s17  ;;  %1907 = vrot.lane.b32.xlu2 %v4095_v6, %s3900_s26 }
  0x85   : > { %v4112_v8 = vpop.permute.xlu2 %163 }
  0x8a   : > { %1905 = vrot.lane.b32.xlu1 %v4083_v4, %s3900_s26 }
  0x8b   : > { %1919 = vrot.lane.b32.xlu0 %v4095_v6, %s3901_s17  ;;  %1917 = vrot.lane.b32.xlu2 %v4083_v4, %s3901_s17 }
  0x8d   : > { %v166_v9 = vpop.permute.xlu2 %165 }
  0x8e   : > { %v348_v28 = vrot.slane %v166_v9, 4  ;;  %v351_v39 = vsel %vm236_vm0, %v166_v9, %v350_v27 }
  0x8f   : > { %v359_v47 = vperm.slane %v351_v39, %v4147_v22 }
  0x90   : > { %v349_v44 = vsel %vm236_vm0, %v348_v28, %v4032_v3 }
  0x91   : > { %v355_v54 = vperm.slane %v349_v44, %v4147_v22  ;;  %v410_v3 = vrot.slane %v359_v47, 4 }
  0x92   : > { %1915 = vrot.lane.b32.xlu1 %v4098_v7, %s3901_s17 }
  0x93   : > { %1929 = vrot.lane.b32.xlu0 %v4083_v4, %s3902_s27  ;;  %1927 = vrot.lane.b32.xlu2 %v4098_v7, %s3902_s27  ;;  %v398_v15 = vrot.slane %v355_v54, 4 }
  0x95   : > { %v4126_v10 = vpop.permute.xlu2 %175 }
  0x9a   : > { %1925 = vrot.lane.b32.xlu1 %v4086_v5, %s3902_s27 }
  0x9b   : > { %1939 = vrot.lane.b32.xlu0 %v4098_v7, %s3903_s28  ;;  %1937 = vrot.lane.b32.xlu2 %v4086_v5, %s3903_s28 }
  0x9c   : > { %v4134_v11 = vpop.permute.xlu1 %155 }
  0x9d   : > { %v4136_v12 = vpop.permute.xlu0 %151  ;;  %v182_v13 = vpop.permute.xlu2 %181  ;;  %v474_v50 = vrot.slane %v4134_v11, 4 }
  0x9e   : > { %v584_v14 = vrot.slane %v182_v13, 4  ;;  %v250_v39 = vrot.slane %v4136_v12, 4 }
  0xa2   : > { %1931 = vrot.lane.b32.xlu1 %v4095_v6, %s3902_s27 }
  0xa3   : > { %1949 = vrot.lane.b32.xlu0 %v4086_v5, %s3904_s29  ;;  %1943 = vrot.lane.b32.xlu2 %v4095_v6, %s3903_s28 }
  0xa4   : > { %v158_v17 = vpop.permute.xlu1 %157 }
  0xa5   : > { %v154_v18 = vpop.permute.xlu0 %153  ;;  %v585_v19 = vsel %vm236_vm0, %v584_v14, %v158_v17  ;;  %v586_v20 = vrot.slane %v158_v17, 4  ;;  %v4145_v21 = vpop.permute.xlu2 %191 }
  0xa6   : > { %v591_v26 = vperm.slane %v585_v19, %v4147_v22  ;;  %v362_v51 = vrot.slane %v154_v18, 4 }
  0xa7   : > { %v587_v23 = vsel %vm236_vm0, %v182_v13, %v586_v20 }
  0xa8   : > { %v595_v24 = vperm.slane %v587_v23, %v4147_v22  ;;  %v620_v37 = vrot.slane %v591_v26, 4 }
  0xaa   : > { %1941 = vrot.lane.b32.xlu1 %v4083_v4, %s3903_s28  ;;  %v632_v32 = vrot.slane %v595_v24, 4 }
  0xab   : > { %1955 = vrot.lane.b32.xlu0 %v4095_v6, %s3904_s29  ;;  %1953 = vrot.lane.b32.xlu2 %v4083_v4, %s3904_s29 }
  0xac   : > { %v170_v29 = vpop.permute.xlu1 %169 }
  0xad   : > { %v168_v31 = vpop.permute.xlu0 %167  ;;  %v572_v33 = vrot.slane %v170_v29, 4  ;;  %v575_v34 = vsel %vm236_vm0, %v170_v29, %v574_v25  ;;  %v4162_v36 = vpop.permute.xlu2 %201 }
  0xae   : > { %v460_v35 = vrot.slane %v168_v31, 4  ;;  %v583_v38 = vperm.slane %v575_v34, %v4147_v22  ;;  %v463_v43 = vsel %vm236_vm0, %v168_v31, %v462_v30  ;;  %v235_v34 = vrot.slane %v4112_v8, 4 }
  0xaf   : > { %v573_v40 = vsel %vm236_vm0, %v572_v33, %v4029_v2  ;;  %v471_v52 = vperm.slane %v463_v43, %v4147_v22 }
  0xb0   : > { %v579_v41 = vperm.slane %v573_v40, %v4147_v22  ;;  %v634_v42 = vrot.slane %v583_v38, 4  ;;  %v461_v45 = vsel %vm236_vm0, %v460_v35, %v4017_v0  ;;  %v4175_v46 = vsel %vm236_vm0, %v632_v32, %v583_v38 }
  0xb1   : > { %v467_v55 = vperm.slane %v461_v45, %v4147_v22  ;;  %v522_v9 = vrot.slane %v471_v52, 4  ;;  %v238_v35 = vrot.slane %v4020_v1, 4  ;;  %v237_v40 = vsel %vm236_vm0, %v235_v34, %v4020_v1 }
  0xb2   : > { %v622_v48 = vrot.slane %v579_v41, 4  ;;  %1951 = vrot.lane.b32.xlu1 %v4098_v7, %s3904_s29  ;;  %v4183_v49 = vsel %vm236_vm0, %v620_v37, %v579_v41  ;;  %v4190_v53 = vsel %vm236_vm0, %v595_v24, %v634_v42  ;;  %v248_v37 = vrot.slane %v4126_v10, 4 }
  0xb3   : > { %1965 = vrot.lane.b32.xlu0 %v4083_v4, %s3905_s30  ;;  %1963 = vrot.lane.b32.xlu2 %v4098_v7, %s3905_s30  ;;  %v510_v20 = vrot.slane %v467_v55, 4  ;;  %v239_v41 = vsel %vm236_vm0, %v4112_v8, %v238_v35  ;;  %v243_v45 = vperm.slane %v237_v40, %v4147_v22  ;;  %v3907_v8 = vmov 1934713408  }
  0xb4   : > { %v180_v56 = vpop.permute.xlu1 %179  ;;  %v4195_v58 = vsel %vm236_vm0, %v591_v26, %v622_v48  ;;  %v249_v42 = vsel %vm236_vm0, %v248_v37, %v4136_v12  ;;  %v247_v1 = vperm.slane %v239_v41, %v4147_v22 }
  0xb5   : > { %v178_v57 = vpop.permute.xlu0 %177  ;;  %v472_v59 = vrot.slane %v180_v56, 4  ;;  %v475_v60 = vsel %vm236_vm0, %v180_v56, %v474_v50  ;;  %v4199_v63 = vpop.permute.xlu2 %211  ;;  %v255_v50 = vperm.slane %v249_v42, %v4147_v22 }
  0xb6   : > { %v360_v61 = vrot.slane %v178_v57, 4  ;;  %v363_v62 = vsel %vm236_vm0, %v178_v57, %v362_v51  ;;  %v483_v0 = vperm.slane %v475_v60, %v4147_v22  ;;  %v298_v12 = vrot.slane %v247_v1, 4 }
  0xb7   : > { %v371_v2 = vperm.slane %v363_v62, %v4147_v22  ;;  %v473_v13 = vsel %vm236_vm0, %v472_v59, %v4134_v11 }
  0xb8   : > { %v361_v14 = vsel %vm236_vm0, %v360_v61, %v154_v18  ;;  %v479_v16 = vperm.slane %v473_v13, %v4147_v22  ;;  %v4212_v24 = vsel %vm236_vm0, %v483_v0, %v522_v9  ;;  %v520_v28 = vrot.slane %v483_v0, 4 }
  0xb9   : > { %v367_v17 = vperm.slane %v361_v14, %v4147_v22  ;;  %v408_v19 = vrot.slane %v371_v2, 4  ;;  %v4209_v23 = vsel %vm236_vm0, %v371_v2, %v410_v3 }
  0xba   : > { %v508_v25 = vrot.slane %v479_v16, 4  ;;  %1961 = vrot.lane.b32.xlu1 %v4086_v5, %s3905_s30  ;;  %v4223_v27 = vsel %vm236_vm0, %v479_v16, %v510_v20  ;;  %v521_v38 = vsel %vm236_vm0, %v520_v28, %v471_v52  ;;  %v289_v52 = vunpack.c.l.s4 %v3907_v8 }
  0xbb   : > { %v396_v26 = vrot.slane %v367_v17, 4  ;;  %v4217_v11 = vsel %vm236_vm0, %v367_v17, %v398_v15  ;;  %v4220_v18 = vsel %vm236_vm0, %v408_v19, %v359_v47  ;;  %v251_v47 = vsel %vm236_vm0, %v4126_v10, %v250_v39 }
  0xbc   : > { %v4225_v29 = vpop.permute.xlu1 %189  ;;  %v4233_v32 = vsel %vm236_vm0, %v508_v25, %v467_v55  ;;  %v259_v51 = vperm.slane %v251_v47, %v4147_v22  ;;  %v284_v55 = vrot.slane %v255_v50, 4  ;;  %v4262_v60 = vunpack.c.0.s8 %v289_v52 }
  0xbd   : > { %v4227_v30 = vpop.permute.xlu0 %187  ;;  %v4230_v31 = vsel %vm236_vm0, %v396_v26, %v355_v54  ;;  %v4235_v33 = vpop.permute.xlu2 %217  ;;  %v286_v54 = vrot.slane %v243_v45, 4  ;;  %v486_v17 = vrot.slane %v4145_v21, 4  ;;  %v260_v19 = vrot.slane %v4199_v63, 4 }
  0xbe   : > { %v296_v56 = vrot.slane %v259_v51, 4  ;;  %v285_v0 = vsel %vm236_vm0, %v284_v55, %v243_v45  ;;  %v299_v2 = vsel %vm236_vm0, %v259_v51, %v298_v12  ;;  %v4295_v40 = vperm.slane %v521_v38, %v4262_v60 }
  0xbf   : > { %v287_v62 = vsel %vm236_vm0, %v255_v50, %v286_v54  ;;  %v4275_v14 = vperm.slane %v285_v0, %v4262_v60  ;;  %v4278_v15 = vperm.slane %v299_v2, %v4262_v60  ;;  %v4300_v45 = vperm.slane %v4183_v49, %v4262_v60 }
  0xc0   : > { %v4271_v9 = vperm.slane %v287_v62, %v4262_v60  ;;  %v297_v13 = vsel %vm236_vm0, %v296_v56, %v247_v1  ;;  %v4304_v47 = vperm.slane %v4175_v46, %v4262_v60  ;;  %v386_v1 = vrot.slane %v4162_v36, 4 }
  0xc1   : > { %v4284_v20 = vperm.slane %v297_v13, %v4262_v60  ;;  %v334_v37 = vrot.slane %v4275_v14, 4  ;;  %v261_v50 = vsel %vm236_vm0, %v260_v19, %v4227_v30  ;;  %v4313_v54 = vperm.slane %v4195_v58, %v4262_v60 }
  0xc2   : > { %1967 = vrot.lane.b32.xlu1 %v4095_v6, %s3905_s30  ;;  %v4317_v49 = vperm.slane %v4190_v53, %v4262_v60  ;;  %v262_v56 = vrot.slane %v4227_v30, 4  ;;  %v596_v13 = vrot.slane %v4235_v33, 4  ;;  %v4342_v19 = vperm.slane %v4230_v31, %v4262_v60 }
  0xc4   : > { %v4250_v43 = vpop.permute.xlu1 %199 }
  0xc5   : > { %v4252_v44 = vpop.permute.xlu0 %193  ;;  %v228_v48 = vpop.permute.xlu2 %227  ;;  %v274_v0 = vrot.slane %v4250_v43, 4 }
  0xc6   : > { %v496_v51 = vrot.slane %v228_v48, 4  ;;  %v598_v46 = vrot.slane %v4252_v44, 4 }
  0xcc   : > { %v4260_v57 = vpop.permute.xlu1 %205 }
  0xcd   : > { %v204_v59 = vpop.permute.xlu0 %203  ;;  %v4264_v10 = vpop.permute.xlu2 %1889 }
  0xce   : > { %v498_v61 = vrot.slane %v204_v59, 4  ;;  %v497_v53 = vsel %vm236_vm0, %v496_v51, %v204_v59  ;;  %v263_v51 = vsel %vm236_vm0, %v4199_v63, %v262_v56  ;;  %v597_v63 = vsel %vm236_vm0, %v596_v13, %v4252_v44 }
  0xcf   : > { %v4356_v31 = vperm.slane %v497_v53, %v4147_v22 }
  0xd0   : > { %v499_v3 = vsel %vm236_vm0, %v228_v48, %v498_v61  ;;  %v566_v48 = vrot.slane %v4295_v40, 4  ;;  %v267_v61 = vperm.slane %v261_v50, %v4147_v22 }
  0xd1   : > { %v507_v16 = vperm.slane %v499_v3, %v4147_v22 }
  0xd3   : > { %v544_v41 = vrot.slane %v507_v16, 4 }
  0xd4   : > { %v216_v25 = vpop.permute.xlu1 %215 }
  0xd5   : > { %v4286_v26 = vpop.permute.xlu0 %213  ;;  %v487_v34 = vsel %vm236_vm0, %v216_v25, %v486_v17  ;;  %v4290_v35 = vpop.permute.xlu2 %1903  ;;  %v484_v12 = vrot.slane %v216_v25, 4 }
  0xd6   : > { %v495_v42 = vperm.slane %v487_v34, %v4147_v22  ;;  %v599_v34 = vsel %vm236_vm0, %v4235_v33, %v598_v46  ;;  %v374_v33 = vrot.slane %v4225_v29, 4 }
  0xd8   : > { %v545_v8 = vsel %vm236_vm0, %v544_v41, %v495_v42  ;;  %v546_v52 = vrot.slane %v495_v42, 4 }
  0xd9   : > { %v4321_v55 = vperm.slane %v545_v8, %v4262_v60 }
  0xda   : > { %v4335_v3 = vsel %vm236_vm0, %v507_v16, %v546_v52  ;;  %v485_v16 = vsel %vm236_vm0, %v484_v12, %v4145_v21  ;;  %v4361_v52 = vperm.slane %v4223_v27, %v4262_v60  ;;  %v310_v21 = vrot.slane %v267_v61, 4 }
  0xdb   : > { %v4332_v2 = vsel %vm236_vm0, %v4321_v55, %v566_v48  ;;  %v4370_v48 = vperm.slane %v599_v34, %v4147_v22  ;;  %v491_v56 = vperm.slane %v485_v16, %v4147_v22  ;;  %v271_v27 = vperm.slane %v263_v51, %v4147_v22 }
  0xdc   : > { %v4338_v30 = vpop.permute.xlu1 %225  ;;  %v4384_v34 = vperm.slane %v597_v63, %v4147_v22  ;;  %v610_v16 = vrot.slane %v4260_v57, 4 }
  0xdd   : > { %v224_v17 = vpop.permute.xlu0 %223  ;;  %v4351_v50 = vpop.permute.xlu2 %1907 }
  0xde   : > { %v272_v41 = vrot.slane %v224_v17, 4  ;;  %v275_v42 = vsel %vm236_vm0, %v224_v17, %v274_v0  ;;  %v2309_v28 = vrot.slane %v4351_v50, 4 }
  0xdf   : > { %v283_v8 = vperm.slane %v275_v42, %v4147_v22  ;;  %v4378_v42 = vperm.slane %v4233_v32, %v4262_v60  ;;  %v658_v32 = vrot.slane %v4370_v48, 4 }
  0xe0   : > { %v273_v12 = vsel %vm236_vm0, %v272_v41, %v4250_v43  ;;  %v532_v43 = vrot.slane %v4356_v31, 4 }
  0xe1   : > { %v279_v0 = vperm.slane %v273_v12, %v4147_v22  ;;  %v320_v53 = vrot.slane %v283_v8, 4  ;;  %v4390_v12 = vperm.slane %v4212_v24, %v4262_v60  ;;  %v384_v24 = vrot.slane %v4338_v30, 4 }
  0xe3   : > { %v308_v41 = vrot.slane %v279_v0, 4  ;;  %v311_v44 = vsel %vm236_vm0, %v279_v0, %v310_v21  ;;  %v321_v21 = vsel %vm236_vm0, %v320_v53, %v271_v27  ;;  %v533_v0 = vsel %vm236_vm0, %v532_v43, %v491_v56 }
  0xe4   : > { %v319_v51 = vperm.slane %v311_v44, %v4262_v60  ;;  %v1894_v17 = vpop.permute.xlu1 %1893  ;;  %v372_v44 = vrot.slane %v4286_v26, 4 }
  0xe5   : > { %v230_v59 = vpop.permute.xlu0 %229  ;;  %v309_v58 = vsel %vm236_vm0, %v308_v41, %v267_v61  ;;  %v2211_v63 = vrot.slane %v1894_v17, 4  ;;  %v1918_v61 = vpop.permute.xlu2 %1917  ;;  %v539_v41 = vperm.slane %v533_v0, %v4262_v60  ;;  %v2311_v0 = vrot.slane %v4095_v6, 4 }
  0xe6   : > { %v608_v39 = vrot.slane %v230_v59, 4  ;;  %v611_v25 = vsel %vm236_vm0, %v230_v59, %v610_v16  ;;  %v336_v38 = vrot.slane %v319_v51, 4  ;;  %v4403_v46 = vperm.slane %v309_v58, %v4262_v60 }
  0xe7   : > { %v4400_v62 = vperm.slane %v611_v25, %v4147_v22  ;;  %v4408_v43 = vsel %vm236_vm0, %v1918_v61, %v2211_v63  ;;  %v4411_v59 = vperm.slane %v321_v21, %v4262_v60  ;;  %v534_v16 = vrot.slane %v491_v56, 4 }
  0xe8   : > { %v337_v53 = vsel %vm236_vm0, %v336_v38, %v4271_v9  ;;  %v609_v25 = vsel %vm236_vm0, %v608_v39, %v4260_v57  ;;  %v335_v38 = vsel %vm236_vm0, %v4403_v46, %v334_v37  ;;  %v322_v63 = vrot.slane %v271_v27, 4 }
  0xe9   : > { %v4418_v58 = vsel %vm236_vm0, %v4400_v62, %v658_v32  ;;  %748 = vxpose.xlu0.b32.start.end [1/1] (short) (narrow) %v337_v53, 8  ;;  %v375_v21 = vsel %vm236_vm0, %v4286_v26, %v374_v33  ;;  %716 = vxpose.xlu2.b32.start.end [1/1] (short) (narrow) %v335_v38, 8  ;;  %v558_v56 = vrot.slane %v4378_v42, 4  ;;  %v373_v57 = vsel %vm236_vm0, %v372_v44, %v4225_v29 }
  0xea   : > { %v385_v39 = vsel %vm236_vm0, %v384_v24, %v4162_v36  ;;  %v387_v37 = vsel %vm236_vm0, %v4338_v30, %v386_v1  ;;  %v570_v27 = vrot.slane %v4390_v12, 4  ;;  %v323_v26 = vsel %vm236_vm0, %v283_v8, %v322_v63 }
  0xeb   : > { %v615_v33 = vperm.slane %v609_v25, %v4147_v22  ;;  %v340_v32 = vrot.slane %v4411_v59, 4  ;;  %v556_v53 = vrot.slane %v539_v41, 4  ;;  %v646_v38 = vrot.slane %v4384_v34, 4 }
  0xec   : > { %v4442_v29 = vperm.slane %v375_v21, %v4147_v22  ;;  %v4444_v44 = vpop.permute.xlu1 %1895  ;;  %v535_v1 = vsel %vm236_vm0, %v4356_v31, %v534_v16  ;;  %v564_v30 = vrot.slane %v4321_v55, 4  ;;  %v391_v8 = vperm.slane %v385_v39, %v4147_v22 }
  0xed   : > { %v4446_v36 = vpop.permute.xlu0 %1891  ;;  %v2312_v24 = vsel %vm236_vm0, %v4351_v50, %v2311_v0  ;;  %v2209_v25 = vrot.slane %v1918_v61, 4  ;;  %v555_v63 = vperm.slane %v4335_v3, %v4262_v60  ;;  %v379_v21 = vperm.slane %v373_v57, %v4147_v22 }
  0xee   : > { %v4458_v13 = vperm.slane %v387_v37, %v4147_v22  ;;  %v331_v31 = vperm.slane %v323_v26, %v4262_v60  ;;  %v644_v16 = vrot.slane %v615_v33, 4  ;;  %v341_v55 = vsel %vm236_vm0, %v340_v32, %v4284_v20 }
  0xef   : > { %v4466_v0 = vsel %vm236_vm0, %v556_v53, %v4378_v42  ;;  %v4469_v61 = vsel %vm236_vm0, %v539_v41, %v558_v56  ;;  %v4472_v3 = vperm.slane %v2312_v24, %v4147_v22  ;;  %v656_v57 = vrot.slane %v4400_v62, 4 }
  0xf0   : > { %v5182_v50 = vrot.slane %v4271_v9, 4  ;;  %v543_v37 = vperm.slane %v535_v1, %v4262_v60  ;;  %v420_v26 = vrot.slane %v391_v8, 4  ;;  %v2210_v32 = vsel %vm236_vm0, %v2209_v25, %v1894_v17 }
  0xf1   : > { %812 = vxpose.xlu0.b32.start.end [1/1] (short) (narrow) %v341_v55, 8  ;;  %v4482_v42 = vsel %vm236_vm0, %v564_v30, %v4295_v40  ;;  %v568_v41 = vrot.slane %v555_v63, 4  ;;  %v332_v56 = vrot.slane %v4403_v46, 4  ;;  %v5183_v62 = vrot.slane %v4361_v52, 4 }
  0xf2   : > { %v339_v39 = vsel %vm236_vm0, %v319_v51, %v5182_v50  ;;  %v560_v53 = vrot.slane %v543_v37, 4  ;;  %v4491_v51 = vsel %vm236_vm0, %v555_v63, %v570_v27  ;;  %v344_v1 = vrot.slane %v331_v31, 4 }
  0xf3   : > { %780 = vxpose.xlu2.b32.start.end [1/1] (short) (narrow) %v339_v39, 8  ;;  %v4488_v9 = vsel %vm236_vm0, %v543_v37, %v5183_v62  ;;  %v4495_v17 = vsel %vm236_vm0, %v568_v41, %v4390_v12  ;;  %v645_v40 = vsel %vm236_vm0, %v644_v16, %v4384_v34  ;;  %v647_v30 = vsel %vm236_vm0, %v615_v33, %v646_v38 }
  0xf4   : > { %v4500_v46 = vpop.permute.xlu1 %1901  ;;  %v4506_v25 = vsel %vm236_vm0, %v560_v53, %v4361_v52  ;;  %v651_v27 = vperm.slane %v645_v40, %v4262_v60  ;;  %v655_v63 = vperm.slane %v647_v30, %v4262_v60  ;;  %v657_v12 = vsel %vm236_vm0, %v656_v57, %v4370_v48 }
  0xf5   : > { %v4502_v24 = vpop.permute.xlu0 %1913  ;;  %v422_v55 = vrot.slane %v379_v21, 4  ;;  %v5184_v34 = vrot.slane %v4098_v7, 4  ;;  %v2199_v38 = vrot.slane %v4083_v4, 4  ;;  %v421_v16 = vsel %vm236_vm0, %v420_v26, %v379_v21 }
  0xf6   : > { %v432_v52 = vrot.slane %v4458_v13, 4  ;;  %v4520_v50 = vperm.slane %v2210_v32, %v4147_v22  ;;  %v333_v39 = vsel %vm236_vm0, %v332_v56, %v4275_v14  ;;  %v668_v37 = vrot.slane %v651_v27, 4 }
  0xf7   : > { %v2088_v33 = vsel %vm236_vm0, %v4290_v35, %v5184_v34  ;;  %v2310_v48 = vsel %vm236_vm0, %v2309_v28, %v4095_v6  ;;  %684 = vxpose.xlu1.b32.start.end [1/1] (short) (narrow) %v333_v39, 8  ;;  %v345_v57 = vsel %vm236_vm0, %v344_v1, %v4278_v15  ;;  %v5185_v41 = vrot.slane %v4300_v45, 4 }
  0xf8   : > { %v672_v26 = vrot.slane %v655_v63, 4  ;;  %v2371_v32 = vrot.slane %v4472_v3, 4  ;;  %v5186_v53 = vrot.slane %v4284_v20, 4  ;;  %v427_v6 = vperm.slane %v421_v16, %v4262_v60 }
  0xf9   : > { %v4531_v21 = vsel %vm236_vm0, %v651_v27, %v5185_v41  ;;  %876 = vxpose.xlu0.b32.start.end [1/1] (short) (narrow) %v345_v57, 8  ;;  %v423_v28 = vsel %vm236_vm0, %v391_v8, %v422_v55  ;;  %v4542_v56 = vsel %vm236_vm0, %v668_v37, %v4300_v45  ;;  %v5187_v1 = vrot.slane %v4313_v54, 4 }
  0xfa   : > { %v343_v14 = vsel %vm236_vm0, %v4411_v59, %v5186_v53  ;;  %v4546_v62 = vsel %vm236_vm0, %v672_v26, %v4313_v54  ;;  %v663_v59 = vperm.slane %v657_v12, %v4262_v60  ;;  %v2220_v40 = vperm.slane %v4408_v43, %v4147_v22 }
  0xfb   : > { %844 = vxpose.xlu2.b32.start.end [1/1] (short) (narrow) %v343_v14, 8  ;;  %v4551_v20 = vsel %vm236_vm0, %v655_v63, %v5187_v1  ;;  %v2245_v8 = vrot.slane %v4520_v50, 4  ;;  %v5188_v30 = vrot.slane %v4278_v15, 4  ;;  %v667_v27 = vperm.slane %v4418_v58, %v4262_v60 }
  0xfc   : > { %v2323_v55 = vrot.slane %v4444_v44, 4  ;;  %v431_v54 = vperm.slane %v423_v28, %v4262_v60  ;;  %v676_v63 = vrot.slane %v663_v59, 4  ;;  %v5189_v34 = vrot.slane %v4304_v47, 4  ;;  %v1906_v43 = vpop.permute.xlu1 %1905 }
  0xfd   : > { %v347_v45 = vsel %vm236_vm0, %v331_v31, %v5188_v30  ;;  %v1920_v16 = vpop.permute.xlu0 %1919  ;;  %v444_v39 = vrot.slane %v427_v6, 4  ;;  %v433_v15 = vsel %vm236_vm0, %v432_v52, %v4442_v29  ;;  %v680_v31 = vrot.slane %v667_v27, 4 }
  0xfe   : > { %v4567_v12 = vsel %vm236_vm0, %v663_v59, %v5189_v34  ;;  %v5190_v37 = vrot.slane %v4317_v49, 4  ;;  %v2197_v57 = vrot.slane %v1906_v43, 4  ;;  %v2200_v41 = vsel %vm236_vm0, %v1906_v43, %v2199_v38 }
  0xff   : > { %v2321_v26 = vrot.slane %v1920_v16, 4  ;;  %v2324_v53 = vsel %vm236_vm0, %v1920_v16, %v2323_v55  ;;  %v2208_v14 = vperm.slane %v2200_v41, %v4147_v22  ;;  %v5191_v1 = vrot.slane %v4342_v19, 4  ;;  %908 = vxpose.xlu1.b32.start.end [1/1] (short) (narrow) %v347_v45, 8 }
 0x100   : > { %v4574_v58 = vsel %vm236_vm0, %v667_v27, %v5190_v37  ;;  %v2332_v28 = vperm.slane %v2324_v53, %v4147_v22  ;;  %v4585_v59 = vsel %vm236_vm0, %v676_v63, %v4304_v47  ;;  %v2198_v30 = vsel %vm236_vm0, %v2197_v57, %v4083_v4  ;;  %v4634_v53 = vpop.permute.xlu2 %1927 }
 0x101   : > { %v447_v52 = vsel %vm236_vm0, %v427_v6, %v5191_v1  ;;  %v2322_v38 = vsel %vm236_vm0, %v2321_v26, %v4444_v44  ;;  %v439_v27 = vperm.slane %v433_v15, %v4262_v60  ;;  %v4594_v55 = vsel %vm236_vm0, %v680_v31, %v4317_v49 }
 0x102   : > { %v2204_v34 = vperm.slane %v2198_v30, %v4147_v22  ;;  %v2259_v6 = vrot.slane %v2208_v14, 4  ;;  %v2369_v43 = vrot.slane %v2332_v28, 4  ;;  %v445_v47 = vsel %vm236_vm0, %v444_v39, %v4342_v19  ;;  %972 = vxpose.xlu0.b32.start.end [1/1] (short) (narrow) %v447_v52, 8 }
 0x103   : > { %v2096_v4 = vperm.slane %v2088_v33, %v4147_v22  ;;  %v2316_v63 = vperm.slane %v2310_v48, %v4147_v22  ;;  %v4602_v44 = vsel %vm236_vm0, %v2332_v28, %v2371_v32  ;;  %940 = vxpose.xlu2.b32.start.end [1/1] (short) (narrow) %v445_v47, 8  ;;  %v407_v49 = vperm.slane %v4217_v11, %v4262_v60 }
 0x104   : > { %v2257_v45 = vrot.slane %v2220_v40, 4  ;;  %v2247_v16 = vrot.slane %v2204_v34, 4  ;;  %v448_v15 = vrot.slane %v431_v54, 4  ;;  %v4607_v31 = vsel %vm236_vm0, %v2245_v8, %v2204_v34  ;;  %v4614_v32 = vpop.permute.xlu1 %1915 }
 0x105   : > { %v434_v19 = vrot.slane %v4442_v29, 4  ;;  %v2099_v39 = vrot.slane %v4446_v36, 4  ;;  %v452_v33 = vrot.slane %v439_v27, 4  ;;  %v4612_v48 = vsel %vm236_vm0, %v2220_v40, %v2259_v6  ;;  %v4616_v37 = vpop.permute.xlu0 %1929 }
 0x106   : > { %v415_v11 = vperm.slane %v4220_v18, %v4262_v60  ;;  %v4622_v57 = vsel %vm236_vm0, %v4520_v50, %v2247_v16  ;;  %v4625_v8 = vsel %vm236_vm0, %v2257_v45, %v2208_v14  ;;  %v4629_v29 = vsel %vm236_vm0, %v2369_v43, %v4472_v3 }
 0x107   : > { %v435_v40 = vsel %vm236_vm0, %v4458_v13, %v434_v19  ;;  %v2359_v41 = vrot.slane %v2316_v63, 4  ;;  %v2328_v26 = vperm.slane %v2322_v38, %v4147_v22  ;;  %v2100_v18 = vsel %vm236_vm0, %v4614_v32, %v2099_v39 }
 0x108   : > { %v2108_v50 = vperm.slane %v2100_v18, %v4147_v22  ;;  %v449_v14 = vsel %vm236_vm0, %v448_v15, %v407_v49  ;;  %v450_v28 = vrot.slane %v407_v49, 4  ;;  %v2147_v1 = vrot.slane %v2096_v4, 4 }
 0x109   : > { %1004 = vxpose.xlu1.b32.start.end [1/1] (short) (narrow) %v449_v14, 8  ;;  %v453_v3 = vsel %vm236_vm0, %v452_v33, %v415_v11  ;;  %v443_v30 = vperm.slane %v435_v40, %v4262_v60  ;;  %v419_v38 = vperm.slane %v4209_v23, %v4262_v60  ;;  %v4649_v6 = vsel %vm236_vm0, %v2328_v26, %v2359_v41  ;;  %v4659_v23 = vpop.permute.xlu2 %1937 }
 0x10a   : > { %v2145_v52 = vrot.slane %v2108_v50, 4  ;;  %v451_v13 = vsel %vm236_vm0, %v431_v54, %v450_v28  ;;  %1068 = vxpose.xlu0.b32.start.end [1/1] (short) (narrow) %v453_v3, 8  ;;  %v4646_v34 = vsel %vm236_vm0, %v2108_v50, %v2147_v1  ;;  %v2357_v47 = vrot.slane %v2328_v26, 4 }
 0x10b   : > { %1036 = vxpose.xlu2.b32.start.end [1/1] (short) (narrow) %v451_v13, 8  ;;  %v454_v45 = vrot.slane %v415_v11, 4  ;;  %v456_v16 = vrot.slane %v443_v30, 4  ;;  %v458_v15 = vrot.slane %v419_v38, 4  ;;  %v1975_v28 = vrot.slane %v4086_v5, 4 }
 0x10c   : > { %v4652_v43 = vsel %vm236_vm0, %v2145_v52, %v2096_v4  ;;  %v4654_v49 = vpop.permute.xlu1 %1925  ;;  %v4663_v33 = vsel %vm236_vm0, %v2357_v47, %v2316_v63  ;;  %v1973_v63 = vrot.slane %v4500_v46, 4 }
 0x10d   : > { %v4656_v54 = vpop.permute.xlu0 %1939  ;;  %v455_v19 = vsel %vm236_vm0, %v439_v27, %v454_v45  ;;  %v459_v39 = vsel %vm236_vm0, %v443_v30, %v458_v15  ;;  %v457_v4 = vsel %vm236_vm0, %v456_v16, %v419_v38  ;;  %v1985_v27 = vrot.slane %v4502_v24, 4 }
 0x10f   : > { %v1986_v26 = vsel %vm236_vm0, %v1985_v27, %v4264_v10 }
 0x110   : > { %v1992_v14 = vperm.slane %v1986_v26, %v4147_v22  ;;  %v1999_v26 = vrot.slane %v4654_v49, 4 }
 0x111   : > { %1100 = vxpose.xlu1.b32.start.end [1/1] (short) (narrow) %v455_v19, 8  ;;  %v4673_v11 = vpop.permute.xlu2 %1943 }
 0x112   : > { %1164 = vxpose.xlu0.b32.start.end [1/1] (short) (narrow) %v459_v39, 8  ;;  %v2021_v13 = vrot.slane %v1992_v14, 4  ;;  %v2011_v39 = vrot.slane %v4659_v23, 4 }
 0x113   : > { %1132 = vxpose.xlu2.b32.start.end [1/1] (short) (narrow) %v457_v4, 8 }
 0x114   : > { %v4666_v40 = vpop.permute.xlu1 %1931 }
 0x115   : > { %v4668_v41 = vpop.permute.xlu0 %1949 }
 0x116   : > { %v1997_v15 = vrot.slane %v4668_v41, 4 }
 0x119   : > { %1196 = vxpose.xlu1.b32.start.end [1/1] (short) (narrow) %v4466_v0, 8  ;;  %v1974_v0 = vsel %vm236_vm0, %v1973_v63, %v4086_v5  ;;  %v4696_v30 = vpop.permute.xlu2 %1953  ;;  %v1976_v5 = vsel %vm236_vm0, %v4500_v46, %v1975_v28  ;;  %v4742_v63 = vperm.slane %v4612_v48, %v4262_v60 }
 0x11a   : > { %1260 = vxpose.xlu0.b32.start.end [1/1] (short) (narrow) %v4506_v25, 8  ;;  %v2223_v25 = vrot.slane %v4616_v37, 4  ;;  %v1980_v1 = vperm.slane %v1974_v0, %v4147_v22  ;;  %v4724_v46 = vperm.slane %v1976_v5, %v4147_v22  ;;  %v2335_v0 = vrot.slane %v4666_v40, 4 }
 0x11b   : > { %1228 = vxpose.xlu2.b32.start.end [1/1] (short) (narrow) %v4469_v61, 8  ;;  %v1987_v61 = vrot.slane %v4264_v10, 4  ;;  %v2307_v5 = vrot.slane %v4742_v63, 4 }
 0x11c   : > { %v4679_v18 = vpop.permute.xlu1 %1941  ;;  %v2023_v38 = vrot.slane %v1980_v1, 4  ;;  %v2022_v16 = vsel %vm236_vm0, %v2021_v13, %v1980_v1 }
 0x11d   : > { %v4681_v50 = vpop.permute.xlu0 %1955  ;;  %v2235_v3 = vrot.slane %v4679_v18, 4  ;;  %v1988_v52 = vsel %vm236_vm0, %v4502_v24, %v1987_v61  ;;  %v4733_v4 = vperm.slane %v2022_v16, %v4262_v60  ;;  %v4754_v61 = vperm.slane %v4625_v8, %v4262_v60 }
 0x11e   : > { %v4708_v47 = vperm.slane %v1988_v52, %v4147_v22  ;;  %v2333_v28 = vrot.slane %v4681_v50, 4 }
 0x121   : > { %1292 = vxpose.xlu1.b32.start.end [1/1] (short) (narrow) %v4488_v9, 8  ;;  %v2224_v9 = vsel %vm236_vm0, %v4696_v30, %v2223_v25 }
 0x122   : > { %1356 = vxpose.xlu0.b32.start.end [1/1] (short) (narrow) %v4332_v2, 8  ;;  %v4713_v45 = vperm.slane %v2224_v9, %v4147_v22  ;;  %v4767_v9 = vpop.permute.xlu2 %1963 }
 0x123   : > { %1324 = vxpose.xlu2.b32.start.end [1/1] (short) (narrow) %v4482_v42, 8  ;;  %v2085_v42 = vrot.slane %v4290_v35, 4 }
 0x124   : > { %v4700_v2 = vpop.permute.xlu1 %1951  ;;  %v2283_v27 = vrot.slane %v4713_v45, 4 }
 0x125   : > { %v4702_v10 = vpop.permute.xlu0 %1965  ;;  %v4721_v35 = vsel %vm236_vm0, %v2085_v42, %v4098_v7  ;;  %v2347_v7 = vrot.slane %v4673_v11, 4  ;;  %v2109_v52 = vrot.slane %v4700_v2, 4 }
 0x126   : > { %v2236_v24 = vsel %vm236_vm0, %v4702_v10, %v2235_v3 }
 0x127   : > { %v4727_v19 = vperm.slane %v2236_v24, %v4147_v22  ;;  %v2000_v24 = vsel %vm236_vm0, %v4668_v41, %v1999_v26  ;;  %v2303_v41 = vrot.slane %v4754_v61, 4  ;;  %v2110_v26 = vsel %vm236_vm0, %v2109_v52, %v4634_v53 }
 0x128   : > { %v4812_v52 = vperm.slane %v2110_v26, %v4147_v22 }
 0x129   : > { %1388 = vxpose.xlu1.b32.start.end [1/1] (short) (narrow) %v4495_v17, 8 }
 0x12a   : > { %1452 = vxpose.xlu0.b32.start.end [1/1] (short) (narrow) %v4542_v56, 8  ;;  %v4736_v56 = vsel %vm236_vm0, %v1992_v14, %v2023_v38  ;;  %v1998_v14 = vsel %vm236_vm0, %v1997_v15, %v4654_v49  ;;  %v2071_v49 = vrot.slane %v4733_v4, 4 }
 0x12b   : > { %1420 = vxpose.xlu2.b32.start.end [1/1] (short) (narrow) %v4491_v51, 8  ;;  %v4746_v51 = vperm.slane %v4629_v29, %v4262_v60  ;;  %v2284_v29 = vsel %vm236_vm0, %v4727_v19, %v2283_v27  ;;  %v2004_v8 = vperm.slane %v1998_v14, %v4147_v22  ;;  %v2336_v27 = vsel %vm236_vm0, %v4681_v50, %v2335_v0 }
 0x12c   : > { %v1962_v25 = vpop.permute.xlu1 %1961  ;;  %v2292_v15 = vperm.slane %v2284_v29, %v4262_v60  ;;  %v2344_v0 = vperm.slane %v2336_v27, %v4147_v22 }
 0x12d   : > { %v2009_v48 = vrot.slane %v1962_v25, 4  ;;  %v2012_v1 = vsel %vm236_vm0, %v1962_v25, %v2011_v39  ;;  %v4781_v39 = vperm.slane %v4649_v6, %v4262_v60  ;;  %v4795_v25 = vperm.slane %v2000_v24, %v4147_v22 }
 0x12e   : > { %v4763_v13 = vperm.slane %v2012_v1, %v4147_v22  ;;  %v4809_v29 = vsel %vm236_vm0, %v2292_v15, %v2307_v5 }
 0x12f   : > { %v2010_v42 = vsel %vm236_vm0, %v2009_v48, %v4659_v23  ;;  %v2047_v48 = vrot.slane %v2004_v8, 4 }
 0x130   : > { %v2016_v16 = vperm.slane %v2010_v42, %v4147_v22  ;;  %v2057_v6 = vrot.slane %v4763_v13, 4 }
 0x131   : > { %1484 = vxpose.xlu1.b32.start.end [1/1] (short) (narrow) %v4531_v21, 8  ;;  %v2334_v21 = vsel %vm236_vm0, %v2333_v28, %v4666_v40  ;;  %v4799_v40 = vperm.slane %v4663_v33, %v4262_v60  ;;  %v2281_v33 = vrot.slane %v4727_v19, 4  ;;  %v2411_v19 = vrot.slane %v4781_v39, 4 }
 0x132   : > { %1548 = vxpose.xlu0.b32.start.end [1/1] (short) (narrow) %v4551_v20, 8  ;;  %v2121_v20 = vrot.slane %v4767_v9, 4  ;;  %v2045_v14 = vrot.slane %v2016_v16, 4  ;;  %v2340_v50 = vperm.slane %v2334_v21, %v4147_v22  ;;  %v2048_v27 = vsel %vm236_vm0, %v2016_v16, %v2047_v48 }
 0x133   : > { %1516 = vxpose.xlu2.b32.start.end [1/1] (short) (narrow) %v4546_v62, 8  ;;  %v4803_v62 = vperm.slane %v4602_v44, %v4262_v60  ;;  %v2407_v16 = vrot.slane %v4799_v40, 4 }
 0x134   : > { %v1968_v28 = vpop.permute.xlu1 %1967  ;;  %v2046_v1 = vsel %vm236_vm0, %v2045_v14, %v2004_v8  ;;  %v2058_v8 = vsel %vm236_vm0, %v2057_v6, %v4795_v25  ;;  %v2122_v5 = vsel %vm236_vm0, %v2121_v20, %v4656_v54  ;;  %v2395_v14 = vrot.slane %v2344_v0, 4 }
 0x135   : > { %v2345_v42 = vrot.slane %v1968_v28, 4  ;;  %v2348_v24 = vsel %vm236_vm0, %v1968_v28, %v2347_v7  ;;  %v2052_v21 = vperm.slane %v2046_v1, %v4262_v60  ;;  %v2419_v7 = vrot.slane %v4803_v62, 4 }
 0x136   : > { %v2356_v44 = vperm.slane %v2348_v24, %v4147_v22  ;;  %v2383_v6 = vrot.slane %v2340_v50, 4  ;;  %v2159_v20 = vrot.slane %v4812_v52, 4  ;;  %v2305_v24 = vrot.slane %v2292_v15, 4 }
 0x137   : > { %v2346_v26 = vsel %vm236_vm0, %v2345_v42, %v4673_v11  ;;  %v2056_v11 = vperm.slane %v2048_v27, %v4262_v60  ;;  %v2069_v42 = vrot.slane %v2052_v21, 4 }
 0x138   : > { %v2352_v28 = vperm.slane %v2346_v26, %v4147_v22  ;;  %v2393_v1 = vrot.slane %v2356_v44, 4  ;;  %v2282_v26 = vsel %vm236_vm0, %v2281_v33, %v4713_v45  ;;  %v2396_v3 = vsel %vm236_vm0, %v2356_v44, %v2395_v14 }
 0x139   : > { %1580 = vxpose.xlu1.b32.start.end [1/1] (short) (narrow) %v4585_v59, 8  ;;  %v4835_v59 = vperm.slane %v2058_v8, %v4262_v60  ;;  %v4846_v27 = vsel %vm236_vm0, %v2305_v24, %v4742_v63  ;;  %v2404_v33 = vperm.slane %v2396_v3, %v4262_v60  ;;  %v5192_v44 = vrot.slane %v4746_v51, 4 }
 0x13a   : > { %1644 = vxpose.xlu0.b32.start.end [1/1] (short) (narrow) %v4594_v55, 8  ;;  %v2381_v48 = vrot.slane %v2352_v28, 4  ;;  %v2288_v55 = vperm.slane %v2282_v26, %v4262_v60  ;;  %v2394_v23 = vsel %vm236_vm0, %v2393_v1, %v2344_v0  ;;  %v2384_v17 = vsel %vm236_vm0, %v2352_v28, %v2383_v6 }
 0x13b   : > { %1612 = vxpose.xlu2.b32.start.end [1/1] (short) (narrow) %v4567_v12, 8  ;;  %v2072_v12 = vsel %vm236_vm0, %v2052_v21, %v2071_v49  ;;  %v2400_v8 = vperm.slane %v2394_v23, %v4262_v60  ;;  %v2392_v15 = vperm.slane %v2384_v17, %v4262_v60  ;;  %v2417_v3 = vrot.slane %v2404_v33, 4 }
 0x13c   : > { %v2301_v38 = vrot.slane %v2288_v55, 4  ;;  %v4851_v45 = vsel %vm236_vm0, %v2288_v55, %v2303_v41  ;;  %v2382_v0 = vsel %vm236_vm0, %v2381_v48, %v2340_v50  ;;  %v4870_v41 = vsel %vm236_vm0, %v2404_v33, %v2419_v7 }
 0x13d   : > { %v4858_v49 = vsel %vm236_vm0, %v2400_v8, %v5192_v44  ;;  %v4861_v63 = vsel %vm236_vm0, %v2392_v15, %v2411_v19  ;;  %v2413_v21 = vrot.slane %v2400_v8, 4  ;;  %v2388_v23 = vperm.slane %v2382_v0, %v4262_v60 }
 0x13e   : > { %v4867_v17 = vsel %vm236_vm0, %v2301_v38, %v4754_v61  ;;  %v2409_v50 = vrot.slane %v2392_v15, 4  ;;  %v2070_v14 = vsel %vm236_vm0, %v2069_v42, %v4733_v4  ;;  %v2128_v61 = vperm.slane %v2122_v5, %v4147_v22 }
 0x13f   : > { %v4876_v19 = vsel %vm236_vm0, %v2413_v21, %v4746_v51  ;;  %v4879_v28 = vsel %vm236_vm0, %v2388_v23, %v2407_v16  ;;  %v2032_v38 = vperm.slane %v4736_v56, %v4262_v60  ;;  %v4886_v7 = vsel %vm236_vm0, %v2417_v3, %v4803_v62 }
 0x140   : > { %v4890_v4 = vsel %vm236_vm0, %v2409_v50, %v4781_v39  ;;  %v5193_v51 = vrot.slane %v4614_v32, 4  ;;  %v2073_v16 = vrot.slane %v2056_v11, 4  ;;  %v2092_v56 = vperm.slane %v4721_v35, %v4147_v22 }
 0x141   : > { %1676 = vxpose.xlu1.b32.start.end [1/1] (short) (narrow) %v4574_v58, 8  ;;  %v2405_v58 = vrot.slane %v2388_v23, 4  ;;  %v2059_v62 = vrot.slane %v4795_v25, 4  ;;  %v5194_v6 = vrot.slane %v4708_v47, 4  ;;  %v2160_v48 = vsel %vm236_vm0, %v2128_v61, %v2159_v20 }
 0x142   : > { %2453 = vxpose.xlu0.b32.start.end [1/1] (short) (narrow) %v2072_v12, 8  ;;  %v2098_v1 = vsel %vm236_vm0, %v5193_v51, %v4446_v36  ;;  %v5195_v32 = vrot.slane %v4656_v54, 4  ;;  %v2077_v42 = vrot.slane %v4835_v59, 4  ;;  %v2111_v35 = vrot.slane %v4634_v53, 4 }
 0x143   : > { %2421 = vxpose.xlu2.b32.start.end [1/1] (short) (narrow) %v2070_v14, 8  ;;  %v4898_v5 = vsel %vm236_vm0, %v2405_v58, %v4799_v40  ;;  %v2034_v39 = vsel %vm236_vm0, %v5194_v6, %v4724_v46  ;;  %v2233_v40 = vrot.slane %v4702_v10, 4  ;;  %v2104_v25 = vperm.slane %v2098_v1, %v4147_v22 }
 0x144   : > { %v2124_v36 = vsel %vm236_vm0, %v4767_v9, %v5195_v32  ;;  %v2060_v24 = vsel %vm236_vm0, %v4763_v13, %v2059_v62  ;;  %v2075_v26 = vrot.slane %v2032_v38, 4  ;;  %v2035_v55 = vrot.slane %v4724_v46, 4 }
 0x145   : > { %v2074_v20 = vsel %vm236_vm0, %v2073_v16, %v2032_v38  ;;  %v2040_v54 = vperm.slane %v2034_v39, %v4262_v60  ;;  %v4922_v9 = vperm.slane %v2160_v48, %v4262_v60  ;;  %v2135_v10 = vrot.slane %v2092_v56, 4 }
 0x146   : > { %v2132_v12 = vperm.slane %v2124_v36, %v4147_v22  ;;  %v2076_v53 = vsel %vm236_vm0, %v2056_v11, %v2075_v26  ;;  %v2112_v8 = vsel %vm236_vm0, %v4700_v2, %v2111_v35  ;;  %v2234_v13 = vsel %vm236_vm0, %v2233_v40, %v4679_v18 }
 0x147   : > { %v2078_v46 = vsel %vm236_vm0, %v2077_v42, %v2040_v54  ;;  %v2068_v15 = vperm.slane %v2060_v24, %v4262_v60  ;;  %v2136_v0 = vsel %vm236_vm0, %v2104_v25, %v2135_v10  ;;  %v2221_v33 = vrot.slane %v4696_v30, 4 }
 0x148   : > { %v2185_v44 = vrot.slane %v4922_v9, 4  ;;  %v2036_v11 = vsel %vm236_vm0, %v4708_v47, %v2035_v55  ;;  %v2157_v21 = vrot.slane %v2128_v61, 4  ;;  %v2169_v2 = vrot.slane %v2132_v12, 4 }
 0x149   : > { %2485 = vxpose.xlu1.b32.start.end [1/1] (short) (narrow) %v2074_v20, 8  ;;  %v2120_v23 = vperm.slane %v2112_v8, %v4147_v22  ;;  %v2240_v18 = vperm.slane %v2234_v13, %v4147_v22  ;;  %v2144_v3 = vperm.slane %v2136_v0, %v4262_v60  ;;  %v2081_v50 = vrot.slane %v2068_v15, 4 }
 0x14a   : > { %2517 = vxpose.xlu0.b32.start.end [1/1] (short) (narrow) %v2076_v53, 8  ;;  %v2079_v14 = vrot.slane %v2040_v54, 4  ;;  %v2158_v58 = vsel %vm236_vm0, %v2157_v21, %v4812_v52  ;;  %v2222_v30 = vsel %vm236_vm0, %v2221_v33, %v4616_v37  ;;  %v2044_v47 = vperm.slane %v2036_v11, %v4262_v60 }
 0x14b   : > { %2549 = vxpose.xlu2.b32.start.end [1/1] (short) (narrow) %v2078_v46, 8  ;;  %v2186_v38 = vsel %vm236_vm0, %v2185_v44, %v2144_v3  ;;  %v2133_v61 = vrot.slane %v2104_v25, 4  ;;  %v2269_v51 = vrot.slane %v2240_v18, 4  ;;  %v2170_v16 = vsel %vm236_vm0, %v2169_v2, %v2120_v23 }
 0x14c   : > { %v2080_v1 = vsel %vm236_vm0, %v4835_v59, %v2079_v14  ;;  %v2082_v62 = vsel %vm236_vm0, %v2081_v50, %v2044_v47  ;;  %v2152_v52 = vperm.slane %v4652_v43, %v4262_v60  ;;  %v2164_v37 = vperm.slane %v2158_v58, %v4262_v60 }
 0x14d   : > { %v2228_v6 = vperm.slane %v2222_v30, %v4147_v22  ;;  %v2176_v39 = vperm.slane %v2170_v16, %v4262_v60  ;;  %v2134_v48 = vsel %vm236_vm0, %v2133_v61, %v2092_v56  ;;  %v2083_v40 = vrot.slane %v2044_v47, 4 }
 0x14e   : > { %v2191_v59 = vrot.slane %v2152_v52, 4  ;;  %v2181_v36 = vrot.slane %v2164_v37, 4  ;;  %v2140_v35 = vperm.slane %v2134_v48, %v4262_v60  ;;  %v2171_v26 = vrot.slane %v2120_v23, 4 }
 0x14f   : > { %v2270_v32 = vsel %vm236_vm0, %v2269_v51, %v2228_v6  ;;  %v2084_v25 = vsel %vm236_vm0, %v2068_v15, %v2083_v40  ;;  %v2252_v55 = vperm.slane %v4607_v31, %v4262_v60  ;;  %v2271_v20 = vrot.slane %v2228_v6, 4 }
 0x150   : > { %v2192_v42 = vsel %vm236_vm0, %v2176_v39, %v2191_v59  ;;  %v2276_v43 = vperm.slane %v2270_v32, %v4262_v60  ;;  %v2182_v24 = vsel %vm236_vm0, %v2181_v36, %v2140_v35  ;;  %v2183_v54 = vrot.slane %v2140_v35, 4 }
 0x151   : > { %2741 = vxpose.xlu1.b32.start.end [1/1] (short) (narrow) %v2186_v38, 8  ;;  %v2172_v10 = vsel %vm236_vm0, %v2132_v12, %v2171_v26  ;;  %v2187_v8 = vrot.slane %v2144_v3, 4  ;;  %v2272_v46 = vsel %vm236_vm0, %v2240_v18, %v2271_v20  ;;  %v2256_v0 = vperm.slane %v4622_v57, %v4262_v60 }
 0x152   : > { %2581 = vxpose.xlu0.b32.start.end [1/1] (short) (narrow) %v2080_v1, 8  ;;  %v2293_v56 = vrot.slane %v2276_v43, 4  ;;  %v2184_v13 = vsel %vm236_vm0, %v2164_v37, %v2183_v54  ;;  %v2180_v31 = vperm.slane %v2172_v10, %v4262_v60  ;;  %v2280_v12 = vperm.slane %v2272_v46, %v4262_v60 }
 0x153   : > { %2613 = vxpose.xlu2.b32.start.end [1/1] (short) (narrow) %v2082_v62, 8  ;;  %v2188_v15 = vsel %vm236_vm0, %v4922_v9, %v2187_v8  ;;  %v2189_v33 = vrot.slane %v2176_v39, 4  ;;  %v2299_v44 = vrot.slane %v2256_v0, 4  ;;  %v2156_v2 = vperm.slane %v4646_v34, %v4262_v60 }
 0x154   : > { %v2294_v53 = vsel %vm236_vm0, %v2293_v56, %v2252_v55  ;;  %v2193_v11 = vrot.slane %v2180_v31, 4  ;;  %v2295_v18 = vrot.slane %v2252_v55, 4  ;;  %v2297_v14 = vrot.slane %v2280_v12, 4 }
 0x155   : > { %v2300_v21 = vsel %vm236_vm0, %v2280_v12, %v2299_v44  ;;  %v2190_v9 = vsel %vm236_vm0, %v2189_v33, %v2152_v52  ;;  %v2195_v57 = vrot.slane %v2156_v2, 4 }
 0x156   : > { %v2194_v23 = vsel %vm236_vm0, %v2193_v11, %v2156_v2  ;;  %v2296_v50 = vsel %vm236_vm0, %v2276_v43, %v2295_v18  ;;  %v2298_v34 = vsel %vm236_vm0, %v2297_v14, %v2256_v0 }
 0x157   : > { %v2196_v3 = vsel %vm236_vm0, %v2180_v31, %v2195_v57 }
 0x159   : > { %2837 = vxpose.xlu1.b32.start.end [1/1] (short) (narrow) %v2192_v42, 8 }
 0x15a   : > { %2645 = vxpose.xlu0.b32.start.end [1/1] (short) (narrow) %v2084_v25, 8 }
 0x15b   : > { %2677 = vxpose.xlu2.b32.start.end [1/1] (short) (narrow) %v2182_v24, 8 }
 0x161   : > { %2933 = vxpose.xlu1.b32.start.end [1/1] (short) (narrow) %v2294_v53, 8 }
 0x162   : > { %2709 = vxpose.xlu0.b32.start.end [1/1] (short) (narrow) %v2184_v13, 8 }
 0x163   : > { %2773 = vxpose.xlu2.b32.start.end [1/1] (short) (narrow) %v2188_v15, 8 }
 0x169   : > { %3029 = vxpose.xlu1.b32.start.end [1/1] (short) (narrow) %v2300_v21, 8 }
 0x16a   : > { %2805 = vxpose.xlu0.b32.start.end [1/1] (short) (narrow) %v2190_v9, 8 }
 0x16b   : > { %2869 = vxpose.xlu2.b32.start.end [1/1] (short) (narrow) %v2194_v23, 8 }
 0x171   : > { %3157 = vxpose.xlu1.b32.start.end [1/1] (short) (narrow) %v4809_v29, 8 }
 0x172   : > { %2901 = vxpose.xlu0.b32.start.end [1/1] (short) (narrow) %v2196_v3, 8 }
 0x173   : > { %2965 = vxpose.xlu2.b32.start.end [1/1] (short) (narrow) %v2296_v50, 8 }
 0x179   : > { %3125 = vxpose.xlu1.b32.start.end [1/1] (short) (narrow) %v4846_v27, 8 }
 0x17a   : > { %2997 = vxpose.xlu0.b32.start.end [1/1] (short) (narrow) %v2298_v34, 8 }
 0x17b   : > { %3061 = vxpose.xlu2.b32.start.end [1/1] (short) (narrow) %v4867_v17, 8 }
 0x181   : > { %3349 = vxpose.xlu1.b32.start.end [1/1] (short) (narrow) %v4858_v49, 8 }
 0x182   : > { %3093 = vxpose.xlu0.b32.start.end [1/1] (short) (narrow) %v4851_v45, 8  ;;  %v732_v29 = vpop.trf.xlu2 }
 0x183   : > { %3285 = vxpose.xlu2.b32.start.end [1/1] (short) (narrow) %v4861_v63, 8 }
 0x189   : > { %3317 = vxpose.xlu1.b32.start.end [1/1] (short) (narrow) %v4876_v19, 8 }
 0x18a   : > { %3413 = vxpose.xlu0.b32.start.end [1/1] (short) (narrow) %v4870_v41, 8 }
 0x18b   : > { %3221 = vxpose.xlu2.b32.start.end [1/1] (short) (narrow) %v4879_v28, 8 }
 0x18c   : > { %v796_v58 = vpop.trf.xlu2 }
 0x18d   : > { %v764_v27 = vpop.trf.xlu0  ;;  %v1714_v49 = vrot.slane %v796_v58, 4 }
 0x18e   : > { %v1708_v19 = vrot.slane %v764_v27, 4 }
 0x18f   : > { %v1715_v38 = vsel %vm236_vm0, %v1714_v49, %v732_v29 }
 0x190   : > { %v1719_v28 = vperm.slane %v1715_v38, %v4147_v22 }
 0x192   : > { %3253 = vxpose.xlu0.b32.start.end [1/1] (short) (narrow) %v4890_v4, 8  ;;  %v1732_v51 = vrot.slane %v1719_v28, 4 }
 0x193   : > { %3381 = vxpose.xlu2.b32.start.end [1/1] (short) (narrow) %v4886_v7, 8 }
 0x194   : > { %v860_v17 = vpop.trf.xlu2 }
 0x195   : > { %v828_v30 = vpop.trf.xlu0 }
 0x19a   : > { %3189 = vxpose.xlu0.b32.start.end [1/1] (short) (narrow) %v4898_v5, 8 }
 0x19b   : > { %v700_v63 = vpop.trf.xlu1 }
 0x19c   : > { %v956_v45 = vpop.trf.xlu2  ;;  %v1709_v41 = vsel %vm236_vm0, %v1708_v19, %v700_v63 }
 0x19d   : > { %v892_v47 = vpop.trf.xlu0  ;;  %v1713_v4 = vperm.slane %v1709_v41, %v4147_v22 }
 0x19e   : > { %v1720_v61 = vrot.slane %v892_v47, 4 }
 0x19f   : > { %v1733_v5 = vsel %vm236_vm0, %v1732_v51, %v1713_v4 }
 0x1a0   : > { %v1721_v52 = vsel %vm236_vm0, %v1720_v61, %v828_v30  ;;  %v1737_v39 = vperm.slane %v1733_v5, %v4262_v60 }
 0x1a1   : > { %v1725_v48 = vperm.slane %v1721_v52, %v4147_v22 }
 0x1a2   : > { %v1746_v35 = vrot.slane %v1737_v39, 4 }
 0x1a3   : > { %v924_v1 = vpop.trf.xlu1 }
 0x1a4   : > { %v1052_v7 = vpop.trf.xlu2  ;;  %v1726_v16 = vrot.slane %v924_v1, 4 }
 0x1a5   : > { %v1754_v32 = vrot.slane %v1052_v7, 4 }
 0x1a6   : > { %v988_v62 = vpop.trf.xlu0  ;;  %v1727_v37 = vsel %vm236_vm0, %v1726_v16, %v860_v17 }
 0x1a7   : > { %v1731_v6 = vperm.slane %v1727_v37, %v4147_v22  ;;  %v1755_v26 = vsel %vm236_vm0, %v1754_v32, %v988_v62 }
 0x1a8   : > { %v1759_v10 = vperm.slane %v1755_v26, %v4147_v22 }
 0x1a9   : > { %v1738_v59 = vrot.slane %v1731_v6, 4 }
 0x1aa   : > { %v1772_v15 = vrot.slane %v1759_v10, 4 }
 0x1ab   : > { %v1739_v40 = vsel %vm236_vm0, %v1738_v59, %v1725_v48 }
 0x1ac   : > { %v1148_v36 = vpop.trf.xlu2  ;;  %v1743_v43 = vperm.slane %v1739_v40, %v4262_v60 }
 0x1ad   : > { %v1020_v42 = vpop.trf.xlu1  ;;  %v1760_v13 = vrot.slane %v1148_v36, 4 }
 0x1ae   : > { %v1748_v25 = vrot.slane %v1020_v42, 4  ;;  %v1084_v24 = vpop.trf.xlu0  ;;  %v1744_v56 = vrot.slane %v1743_v43, 4  ;;  %v1747_v55 = vsel %vm236_vm0, %v1743_v43, %v1746_v35 }
 0x1af   : > { %1870 = vst.msk [vmem:[%s5009_s3 + $0x8] sm:$0xff] %vm1868_vm1, %v1747_v55  ;;  %v1761_v33 = vsel %vm236_vm0, %v1760_v13, %v1084_v24 }
 0x1b0   : > { %v1749_v20 = vsel %vm236_vm0, %v1748_v25, %v956_v45  ;;  %v1745_v54 = vsel %vm236_vm0, %v1744_v56, %v1737_v39  ;;  %v1765_v2 = vperm.slane %v1761_v33, %v4147_v22 }
 0x1b1   : > { %1869 = vst.msk [vmem:[%s5009_s3] sm:$0xff] %vm1868_vm1, %v1745_v54  ;;  %v1753_v53 = vperm.slane %v1749_v20, %v4147_v22 }
 0x1b3   : > { %v1773_v12 = vsel %vm236_vm0, %v1772_v15, %v1753_v53 }
 0x1b4   : > { %v1244_v8 = vpop.trf.xlu2  ;;  %v1777_v21 = vperm.slane %v1773_v12, %v4262_v60 }
 0x1b5   : > { %v1116_v46 = vpop.trf.xlu1 }
 0x1b6   : > { %v1180_v0 = vpop.trf.xlu0  ;;  %v1786_v50 = vrot.slane %v1777_v21, 4 }
 0x1b7   : > { %v1766_v31 = vrot.slane %v1180_v0, 4 }
 0x1b9   : > { %v1767_v44 = vsel %vm236_vm0, %v1766_v31, %v1116_v46 }
 0x1ba   : > { %v1771_v11 = vperm.slane %v1767_v44, %v4147_v22 }
 0x1bc   : > { %v1778_v9 = vrot.slane %v1771_v11, 4  ;;  %v1340_v23 = vpop.trf.xlu2 }
 0x1bd   : > { %v1212_v57 = vpop.trf.xlu1 }
 0x1be   : > { %v1779_v18 = vsel %vm236_vm0, %v1778_v9, %v1765_v2  ;;  %v1276_v3 = vpop.trf.xlu0 }
 0x1bf   : > { %v1783_v14 = vperm.slane %v1779_v18, %v4262_v60  ;;  %v1788_v27 = vrot.slane %v1276_v3, 4 }
 0x1c1   : > { %v1784_v34 = vrot.slane %v1783_v14, 4  ;;  %v1787_v29 = vsel %vm236_vm0, %v1783_v14, %v1786_v50  ;;  %v1789_v38 = vsel %vm236_vm0, %v1788_v27, %v1212_v57 }
 0x1c2   : > { %1872 = vst.msk [vmem:[%s5009_s3 + $0x28] sm:$0xff] %vm1868_vm1, %v1787_v29  ;;  %v1793_v28 = vperm.slane %v1789_v38, %v4147_v22 }
 0x1c3   : > { %v1785_v58 = vsel %vm236_vm0, %v1784_v34, %v1777_v21 }
 0x1c4   : > { %1871 = vst.msk [vmem:[%s5009_s3 + $0x20] sm:$0xff] %vm1868_vm1, %v1785_v58  ;;  %v1436_v17 = vpop.trf.xlu2 }
 0x1c5   : > { %v1308_v30 = vpop.trf.xlu1  ;;  %v1806_v49 = vrot.slane %v1436_v17, 4 }
 0x1c6   : > { %v1794_v45 = vrot.slane %v1308_v30, 4  ;;  %v1372_v63 = vpop.trf.xlu0 }
 0x1c7   : > { %v1807_v41 = vsel %vm236_vm0, %v1806_v49, %v1372_v63 }
 0x1c8   : > { %v1795_v19 = vsel %vm236_vm0, %v1794_v45, %v1244_v8  ;;  %v1811_v51 = vperm.slane %v1807_v41, %v4147_v22 }
 0x1c9   : > { %v1799_v47 = vperm.slane %v1795_v19, %v4147_v22 }
 0x1ca   : > { %v1818_v37 = vrot.slane %v1811_v51, 4 }
 0x1cb   : > { %v1812_v4 = vrot.slane %v1799_v47, 4 }
 0x1cc   : > { %v1532_v61 = vpop.trf.xlu2 }
 0x1cd   : > { %v1813_v7 = vsel %vm236_vm0, %v1812_v4, %v1793_v28  ;;  %v1404_v1 = vpop.trf.xlu1  ;;  %v1828_v55 = vrot.slane %v1532_v61, 4 }
 0x1ce   : > { %v1800_v16 = vrot.slane %v1404_v1, 4  ;;  %v1468_v62 = vpop.trf.xlu0  ;;  %v1817_v5 = vperm.slane %v1813_v7, %v4262_v60 }
 0x1cf   : > { %v1829_v10 = vsel %vm236_vm0, %v1828_v55, %v1468_v62 }
 0x1d0   : > { %v1801_v52 = vsel %vm236_vm0, %v1800_v16, %v1340_v23  ;;  %v1826_v48 = vrot.slane %v1817_v5, 4  ;;  %v1833_v46 = vperm.slane %v1829_v10, %v4147_v22 }
 0x1d1   : > { %v1805_v6 = vperm.slane %v1801_v52, %v4147_v22 }
 0x1d3   : > { %v1819_v39 = vsel %vm236_vm0, %v1818_v37, %v1805_v6 }
 0x1d4   : > { %v1823_v32 = vperm.slane %v1819_v39, %v4262_v60  ;;  %v1628_v59 = vpop.trf.xlu2 }
 0x1d5   : > { %v1500_v36 = vpop.trf.xlu1 }
 0x1d6   : > { %v1824_v40 = vrot.slane %v1823_v32, 4  ;;  %v1827_v42 = vsel %vm236_vm0, %v1823_v32, %v1826_v48  ;;  %v1564_v35 = vpop.trf.xlu0 }
 0x1d7   : > { %1874 = vst.msk [vmem:[%s5009_s3 + $0x48] sm:$0xff] %vm1868_vm1, %v1827_v42  ;;  %v1834_v25 = vrot.slane %v1564_v35, 4 }
 0x1d8   : > { %v1825_v43 = vsel %vm236_vm0, %v1824_v40, %v1817_v5 }
 0x1d9   : > { %1873 = vst.msk [vmem:[%s5009_s3 + $0x40] sm:$0xff] %vm1868_vm1, %v1825_v43  ;;  %v1835_v24 = vsel %vm236_vm0, %v1834_v25, %v1500_v36 }
 0x1da   : > { %v1839_v54 = vperm.slane %v1835_v24, %v4147_v22 }
 0x1dc   : > { %v2437_v26 = vpop.trf.xlu2  ;;  %v1852_v53 = vrot.slane %v1839_v54, 4 }
 0x1dd   : > { %v1596_v56 = vpop.trf.xlu1 }
 0x1de   : > { %v1660_v20 = vpop.trf.xlu0  ;;  %v1853_v12 = vsel %vm236_vm0, %v1852_v53, %v1833_v46 }
 0x1df   : > { %v1840_v8 = vrot.slane %v1660_v20, 4  ;;  %v1857_v21 = vperm.slane %v1853_v12, %v4262_v60 }
 0x1e1   : > { %v1841_v33 = vsel %vm236_vm0, %v1840_v8, %v1596_v56  ;;  %v1866_v3 = vrot.slane %v1857_v21, 4 }
 0x1e2   : > { %v1845_v2 = vperm.slane %v1841_v33, %v4147_v22 }
 0x1e4   : > { %v2565_v13 = vpop.trf.xlu2 }
 0x1e5   : > { %v1692_v15 = vpop.trf.xlu1 }
 0x1e6   : > { %v1846_v0 = vrot.slane %v1692_v15, 4  ;;  %v2469_v31 = vpop.trf.xlu0 }
 0x1e8   : > { %v1847_v44 = vsel %vm236_vm0, %v1846_v0, %v1628_v59 }
 0x1e9   : > { %v1851_v11 = vperm.slane %v1847_v44, %v4147_v22 }
 0x1eb   : > { %v1858_v9 = vrot.slane %v1851_v11, 4 }
 0x1ec   : > { %v2629_v23 = vpop.trf.xlu2 }
 0x1ed   : > { %v1859_v57 = vsel %vm236_vm0, %v1858_v9, %v1845_v2  ;;  %v2501_v18 = vpop.trf.xlu1  ;;  %v3457_v28 = vrot.slane %v2629_v23, 4 }
 0x1ee   : > { %v1863_v50 = vperm.slane %v1859_v57, %v4262_v60  ;;  %v2533_v14 = vpop.trf.xlu0  ;;  %v3445_v63 = vrot.slane %v2501_v18, 4 }
 0x1ef   : > { %v3451_v58 = vrot.slane %v2533_v14, 4  ;;  %v3458_v16 = vsel %vm236_vm0, %v3457_v28, %v2565_v13 }
 0x1f0   : > { %v1864_v34 = vrot.slane %v1863_v50, 4  ;;  %v1867_v29 = vsel %vm236_vm0, %v1863_v50, %v1866_v3  ;;  %v3446_v19 = vsel %vm236_vm0, %v3445_v63, %v2437_v26  ;;  %v3462_v37 = vperm.slane %v3458_v16, %v4147_v22 }
 0x1f1   : > { %1876 = vst.msk [vmem:[%s5009_s3 + $0x68] sm:$0xff] %vm1868_vm1, %v1867_v29  ;;  %v3452_v30 = vsel %vm236_vm0, %v3451_v58, %v2469_v31  ;;  %v3450_v61 = vperm.slane %v3446_v19, %v4147_v22 }
 0x1f2   : > { %v1865_v27 = vsel %vm236_vm0, %v1864_v34, %v1857_v21  ;;  %v3456_v38 = vperm.slane %v3452_v30, %v4147_v22 }
 0x1f3   : > { %1875 = vst.msk [vmem:[%s5009_s3 + $0x60] sm:$0xff] %vm1868_vm1, %v1865_v27 }
 0x1f4   : > { %v2693_v17 = vpop.trf.xlu2  ;;  %v3469_v47 = vrot.slane %v3456_v38, 4 }
 0x1f5   : > { %v2757_v49 = vpop.trf.xlu1 }
 0x1f6   : > { %v2597_v45 = vpop.trf.xlu0  ;;  %v3470_v1 = vsel %vm236_vm0, %v3469_v47, %v3450_v61  ;;  %v3485_v20 = vrot.slane %v2757_v49, 4 }
 0x1f7   : > { %v3474_v52 = vperm.slane %v3470_v1, %v4262_v60 }
 0x1f8   : > { %v3486_v10 = vsel %vm236_vm0, %v3485_v20, %v2693_v17 }
 0x1f9   : > { %v3483_v36 = vrot.slane %v3474_v52, 4  ;;  %v3490_v15 = vperm.slane %v3486_v10, %v4147_v22 }
 0x1fc   : > { %v2789_v41 = vpop.trf.xlu2 }
 0x1fd   : > { %v2853_v4 = vpop.trf.xlu1  ;;  %v3491_v43 = vrot.slane %v2789_v41, 4 }
 0x1fe   : > { %v2661_v7 = vpop.trf.xlu0 }
 0x1ff   : > { %v3463_v51 = vrot.slane %v2661_v7, 4 }
 0x201   : > { %v3464_v62 = vsel %vm236_vm0, %v3463_v51, %v2597_v45 }
 0x202   : > { %v3468_v5 = vperm.slane %v3464_v62, %v4147_v22 }
 0x204   : > { %v3475_v6 = vrot.slane %v3468_v5, 4  ;;  %v2885_v39 = vpop.trf.xlu2 }
 0x205   : > { %v2949_v48 = vpop.trf.xlu1  ;;  %v3497_v13 = vrot.slane %v2885_v39, 4 }
 0x206   : > { %v3476_v32 = vsel %vm236_vm0, %v3475_v6, %v3462_v37  ;;  %v2725_v59 = vpop.trf.xlu0 }
 0x207   : > { %v3480_v40 = vperm.slane %v3476_v32, %v4262_v60  ;;  %v3492_v26 = vsel %vm236_vm0, %v3491_v43, %v2725_v59 }
 0x208   : > { %v3496_v54 = vperm.slane %v3492_v26, %v4147_v22 }
 0x209   : > { %v3481_v42 = vrot.slane %v3480_v40, 4  ;;  %v3484_v35 = vsel %vm236_vm0, %v3480_v40, %v3483_v36 }
 0x20a   : > { %3722 = vst.msk [vmem:[%s5009_s3 + $0x18] sm:$0xff] %vm1868_vm1, %v3484_v35  ;;  %v3509_v53 = vrot.slane %v3496_v54, 4 }
 0x20b   : > { %v3482_v25 = vsel %vm236_vm0, %v3481_v42, %v3474_v52 }
 0x20c   : > { %3721 = vst.msk [vmem:[%s5009_s3 + $0x10] sm:$0xff] %vm1868_vm1, %v3482_v25  ;;  %v2981_v24 = vpop.trf.xlu2  ;;  %v3510_v12 = vsel %vm236_vm0, %v3509_v53, %v3490_v15 }
 0x20d   : > { %v3045_v56 = vpop.trf.xlu1  ;;  %v3514_v2 = vperm.slane %v3510_v12, %v4262_v60 }
 0x20e   : > { %v2821_v55 = vpop.trf.xlu0  ;;  %v3531_v44 = vrot.slane %v3045_v56, 4 }
 0x20f   : > { %v3498_v33 = vsel %vm236_vm0, %v3497_v13, %v2821_v55  ;;  %v3523_v34 = vrot.slane %v3514_v2, 4 }
 0x210   : > { %v3502_v9 = vperm.slane %v3498_v33, %v4147_v22  ;;  %v3532_v18 = vsel %vm236_vm0, %v3531_v44, %v2981_v24 }
 0x211   : > { %v3536_v27 = vperm.slane %v3532_v18, %v4147_v22 }
 0x213   : > { %v3549_v47 = vrot.slane %v3536_v27, 4 }
 0x214   : > { %v3077_v8 = vpop.trf.xlu2 }
 0x215   : > { %v3173_v46 = vpop.trf.xlu1 }
 0x216   : > { %v2917_v0 = vpop.trf.xlu0  ;;  %v3543_v38 = vrot.slane %v3173_v46, 4 }
 0x217   : > { %v3503_v31 = vrot.slane %v2917_v0, 4 }
 0x219   : > { %v3504_v11 = vsel %vm236_vm0, %v3503_v31, %v2853_v4 }
 0x21a   : > { %v3508_v21 = vperm.slane %v3504_v11, %v4147_v22 }
 0x21c   : > { %v3515_v23 = vrot.slane %v3508_v21, 4  ;;  %v3301_v57 = vpop.trf.xlu2 }
 0x21d   : > { %v3141_v14 = vpop.trf.xlu1  ;;  %v3571_v24 = vrot.slane %v3301_v57, 4 }
 0x21e   : > { %v3516_v3 = vsel %vm236_vm0, %v3515_v23, %v3502_v9  ;;  %v3013_v50 = vpop.trf.xlu0  ;;  %v3537_v19 = vrot.slane %v3141_v14, 4 }
 0x21f   : > { %v3520_v29 = vperm.slane %v3516_v3, %v4262_v60  ;;  %v3525_v58 = vrot.slane %v3013_v50, 4 }
 0x220   : > { %v3538_v61 = vsel %vm236_vm0, %v3537_v19, %v3077_v8 }
 0x221   : > { %v3521_v17 = vrot.slane %v3520_v29, 4  ;;  %v3524_v30 = vsel %vm236_vm0, %v3520_v29, %v3523_v34  ;;  %v3526_v49 = vsel %vm236_vm0, %v3525_v58, %v2949_v48  ;;  %v3542_v62 = vperm.slane %v3538_v61, %v4147_v22 }
 0x222   : > { %3724 = vst.msk [vmem:[%s5009_s3 + $0x38] sm:$0xff] %vm1868_vm1, %v3524_v30  ;;  %v3530_v45 = vperm.slane %v3526_v49, %v4147_v22 }
 0x223   : > { %v3522_v63 = vsel %vm236_vm0, %v3521_v17, %v3514_v2 }
 0x224   : > { %3723 = vst.msk [vmem:[%s5009_s3 + $0x30] sm:$0xff] %vm1868_vm1, %v3522_v63  ;;  %v3237_v41 = vpop.trf.xlu2  ;;  %v3550_v28 = vsel %vm236_vm0, %v3549_v47, %v3530_v45 }
 0x225   : > { %v3365_v1 = vpop.trf.xlu1  ;;  %v3554_v16 = vperm.slane %v3550_v28, %v4262_v60  ;;  %v3572_v54 = vsel %vm236_vm0, %v3571_v24, %v3237_v41 }
 0x226   : > { %v3109_v4 = vpop.trf.xlu0  ;;  %v3576_v10 = vperm.slane %v3572_v54, %v4147_v22 }
 0x227   : > { %v3544_v7 = vsel %vm236_vm0, %v3543_v38, %v3109_v4  ;;  %v3563_v37 = vrot.slane %v3554_v16, 4 }
 0x228   : > { %v3548_v51 = vperm.slane %v3544_v7, %v4147_v22  ;;  %v3589_v0 = vrot.slane %v3576_v10, 4 }
 0x22a   : > { %v3555_v5 = vrot.slane %v3548_v51, 4 }
 0x22c   : > { %v3556_v52 = vsel %vm236_vm0, %v3555_v5, %v3542_v62  ;;  %v3397_v48 = vpop.trf.xlu2 }
 0x22d   : > { %v3560_v6 = vperm.slane %v3556_v52, %v4262_v60  ;;  %v3577_v35 = vrot.slane %v3397_v48, 4  ;;  %v3333_v43 = vpop.trf.xlu1 }
 0x22e   : > { %v3429_v39 = vpop.trf.xlu0 }
 0x22f   : > { %v3561_v32 = vrot.slane %v3560_v6, 4  ;;  %v3564_v59 = vsel %vm236_vm0, %v3560_v6, %v3563_v37  ;;  %v3583_v36 = vrot.slane %v3429_v39, 4  ;;  %v3578_v26 = vsel %vm236_vm0, %v3577_v35, %v3333_v43 }
 0x230   : > { %3726 = vst.msk [vmem:[%s5009_s3 + $0x58] sm:$0xff] %vm1868_vm1, %v3564_v59  ;;  %v3582_v20 = vperm.slane %v3578_v26, %v4147_v22 }
 0x231   : > { %v3562_v40 = vsel %vm236_vm0, %v3561_v32, %v3554_v16  ;;  %v3584_v42 = vsel %vm236_vm0, %v3583_v36, %v3365_v1 }
 0x232   : > { %3725 = vst.msk [vmem:[%s5009_s3 + $0x50] sm:$0xff] %vm1868_vm1, %v3562_v40  ;;  %v3588_v25 = vperm.slane %v3584_v42, %v4147_v22 }
 0x234   : > { %v3595_v55 = vrot.slane %v3588_v25, 4 }
 0x236   : > { %v3269_v56 = vpop.trf.xlu0  ;;  %v3596_v53 = vsel %vm236_vm0, %v3595_v55, %v3582_v20 }
 0x237   : > { %v3565_v8 = vrot.slane %v3269_v56, 4  ;;  %v3600_v46 = vperm.slane %v3596_v53, %v4262_v60 }
 0x239   : > { %v3601_v33 = vrot.slane %v3600_v46, 4 }
 0x23e   : > { %v3205_v13 = vpop.trf.xlu0 }
 0x23f   : > { %v3566_v15 = vsel %vm236_vm0, %v3565_v8, %v3205_v13 }
 0x240   : > { %v3570_v31 = vperm.slane %v3566_v15, %v4147_v22 }
 0x242   : > { %v3590_v12 = vsel %vm236_vm0, %v3589_v0, %v3570_v31 }
 0x243   : > { %v3594_v44 = vperm.slane %v3590_v12, %v4262_v60 }
 0x245   : > { %v3602_v11 = vsel %vm236_vm0, %v3601_v33, %v3594_v44  ;;  %v3603_v21 = vrot.slane %v3594_v44, 4 }
 0x246   : > { %3727 = vst.msk [vmem:[%s5009_s3 + $0x70] sm:$0xff] %vm1868_vm1, %v3602_v11 }
 0x247   : > { %v3604_v2 = vsel %vm236_vm0, %v3600_v46, %v3603_v21 }
 0x248   : > { %3728 = vst.msk [vmem:[%s5009_s3 + $0x78] sm:$0xff] %vm1868_vm1, %v3604_v2 }
 0x249   : > { %3856 = shalt.err (!%p3853_p4)
}
 0x24a   : > { %s3908_s21 = smov 128   ;;  %s3909_s27 = smov 8  }
 0x24b   : > { %3741 = dma.vmem_to_hbm [thread:$0]  (%p3970_p11), %s3629_s14, 2048, %s3631_s10, %s3615_s16, %s3908_s21, %s3908_s21, %s3909_s27  }
 0x24c PF: > { %s3645_s28 = sand.u32 1, %s3883_s6   ;;  %p5196_p7 = scmp.ge.s32.totalorder %s3895_s9, 2 }
 0x24d   : > { %s3646_s29 = scalar_lea.sflag [#allocation4], %s3645_s28 }
 0x24e   : > { %p3748_p5 = pnand %p5196_p7, %p3974_p12 }
 0x250   : > { %p3749_p8 = pneg %p3748_p5 }
 0x252   : > { %3878 = dma.done.wait (%p3749_p8), %s3646_s29, 2048  }
 0x253   : > { %3880 = vsyncadd (%p3749_p8), %s3646_s29, 4294965248  ;;  %p14_p10 = scmp.ge.s32.totalorder %s3945_s12, 4   ;;  %s5197_s6 = smov %s3887_s7 }
 0x254   : > { %s5198_s7 = smov %s3891_s8  ;;  %s5199_s8 = smov %s3957_s15 }
 0x255   : > { %s5200_s9 = smov %s3945_s12  ;;  %16 = sbr.rel (!%p14_p10) target bundleno = 5 (0x5), region = 77 }
 0x25a   :  { %3652 = vsyncpa [#allocation3], 1 }
 0x25b   :  { %3654 = vsyncpa [#allocation3 + $0x1], 1 }
 0x25c   :  { %3655 = vsyncpa [#allocation4], 1 }
 0x25d   :  { %3657 = vsyncpa [#allocation4 + $0x1], 1 }

// kernel: tpu_custom_call.1
= control target key start
LH: loop header
LB: loop body
LE: loop exit
PB: predicated region body
PF: predicated region fallthrough
CT: control target
= control target key end

     0   :  { %6 = vsyncpa [#allocation3], 0  ;;  %s1646_s0 = inlined_call_operand.hbm [shape: f32[2,4,16,16], index: 0, kind: input, shape index: {}]   ;;  %s1647_s1 = inlined_call_operand.vmem [shape: f32[2,16,8,8], index: 1, kind: output, shape index: {}]  }
   0x1   :  { %8 = vsyncpa [#allocation3 + $0x1], 0  ;;  %s1349_s6 = smov 0   ;;  %s1351_s7 = smov 0  }
   0x2   :  { %s1353_s8 = smov 0   ;;  %s1355_s9 = smov 0  }
   0x3   :  { %s1357_s10 = smov 0   ;;  %s1359_s11 = smov 0  }
   0x4   :  { %s1361_s12 = smov 0   ;;  %s1363_s13 = smov 0  }
   0x5 LB: > { %s1132_s14 = sadd.s32 4294967295, %s1326_s13   ;;  %s23_s15 = sadd.s32 1, %s1318_s11  ;;  %s1326_s13 = sphi %s1363_s13, %s14_s13   ;;  %s1322_s12 = sphi %s1361_s12, %s1656_s12   ;;  %s1318_s11 = sphi %s1359_s11, %s1655_s11   ;;  %s1314_s10 = sphi %s1357_s10, %s1654_s10   ;;  %s1310_s9 = sphi %s1355_s9, %s1653_s9   ;;  %s1306_s8 = sphi %s1353_s8, %s1652_s8   ;;  %s1302_s7 = sphi %s1351_s7, %s1651_s7   ;;  %s1298_s6 = sphi %s1349_s6, %s1650_s6  }
   0x6   : > { %p24_p0 = scmp.ge.s32.totalorder %s23_s15, 4  ;;  %s26_s16 = sadd.s32 1, %s1322_s12 }
   0x7   : > { %s35_s17 = sadd.s32 1, %s1306_s8  ;;  %p42_p1 = scmp.ne.s32.totalorder %s1306_s8, %s1302_s7 }
   0x8   : > { %s1658_s15 = smov (%p24_p0, %s23_s15), 0  ;;  %s1660_s16 = smov (!%p24_p0, %s26_s16), %s1322_s12 }
   0x9   : > { %s31_s18 = ssub.s32 %s1318_s11, %s1658_s15  ;;  %p43_p2 = scmp.eq.s32.totalorder %s1326_s13, 0 }
   0xa   : > { %p28_p3 = scmp.ge.s32.totalorder %s1660_s16, 2  ;;  %p48_p4 = scmp.ne.s32.totalorder %s1302_s7, %s1298_s6 }
   0xb   : > { %p1400_p5 = por %p43_p2, %p42_p1  ;;  %p49_p6 = scmp.eq.s32.totalorder %s1132_s14, 0 }
   0xc   : > { %s1662_s16 = smov (%p28_p3, %s1660_s16), 0  ;;  %p1153_p8 = scmp.lt.s32.totalorder %s1326_s13, 8 }
   0xd   : > { %p1406_p7 = por %p49_p6, %p48_p4  ;;  %s30_s21 = ssub.s32 %s1322_s12, %s1662_s16 }
   0xe   : > { %s32_s22 = sor.u32 %s31_s18, %s30_s21  ;;  %s100_s23 = sand.u32 1, %s1306_s8  }
   0xf   : > { %p33_p9 = scmp.eq.s32.totalorder %s32_s22, 0  ;;  %s1136_s24 = sshll.u32 %s100_s23, 4 }
  0x10   : > { %s1137_s25 = sshll.u32 %s1318_s11, 1  ;;  %s1138_s27 = sshll.u32 %s1322_s12, 3 }
  0x11   : > { %s1416_s26 = scalar_select %p33_p9, %s1306_s8, %s35_s17  }
  0x12   : > { %s109_s28 = sadd.s32 %s1138_s27, %s1137_s25  ;;  %s104_s29 = scalar_lea.vmem [#allocation2], %s1136_s24 }
  0x13   : > { %s114_s30 = sshll.u32 %s104_s29, 4  ;;  %s1139_s2 = sshll.u32 %s109_s28, 3  ;;  %s115_s30 = int_to_ptr.vmem [resolvable:$true] %s114_s30 }
  0x14   : > { %s111_s5 = scalar_lea.hbm %s1646_s0, %s1139_s2  ;;  %p1150_p10 = pnand %p1153_p8, %p1400_p5 }
  0x15   : > { %s112_s6 = sshll.u32 %s111_s5, 4  ;;  %p1140_p11 = scmp.ge.s32.totalorder %s1326_s13, 1  ;;  %s113_s6 = int_to_ptr.hbm [resolvable:$true] %s112_s6 }
  0x16   : > { %s101_s14 = scalar_lea.sflag [#allocation3], %s100_s23  ;;  %s1328_s17 = smov 128  }
  0x17   : > { %s1329_s18 = smov 8   ;;  %p122_p12 = scmp.lt.s32.totalorder %s1326_s13, 9 }
  0x18   : > { %1152 = dma.hbm_to_vmem [thread:$0]  (!%p1150_p10), %s113_s6, 256, %s115_s30, %s101_s14, %s1328_s17, %s1328_s17, %s1329_s18  }
  0x19   : > { %p123_p13 = pnand %p1140_p11, %p122_p12 }
  0x1a   : > { %s128_s21 = sand.u32 (!%p123_p13), 1, %s1302_s7  }
  0x1b   : > { %126 = sbr.rel (%p123_p13) target bundleno = 407 (0x197), region = 24  ;;  %s1141_s22 = sshll.u32 (!%p123_p13), %s128_s21, 4 }
  0x1c   : > { %s129_s24 = scalar_lea.sflag (!%p123_p13), [#allocation3], %s128_s21  ;;  %s132_s25 = scalar_lea.vmem (!%p123_p13), [#allocation2], %s1141_s22 }
  0x20   : > { %1293 = dma.done.wait (%p1406_p7), %s129_s24, 256  }
  0x21   : > { %1295 = vsyncadd (%p1406_p7), %s129_s24, 4294967040  ;;  %v166_v0 = vld [vmem:[%s132_s25] sm:$0xff]  ;;  %s1330_s19 = smov 124   ;;  %s1331_s23 = smov 126   ;;  %v1433_v1 = vld [vmem:[%s132_s25 + $0x8] sm:$0xff]  ;;  %vm213_vm0 = vcmask 1047556  }
  0x22   : > { %176 = vrot.lane.b32.xlu1 %v166_v0, %s1330_s19  ;;  %170 = vrot.lane.b32.xlu0 %v166_v0, %s1331_s23  ;;  %s1332_s27 = smov 122   ;;  %s1333_s28 = smov 120   ;;  %v1337_v8 = vmov 1983009808   ;;  %v215_v10 = vrot.slane %v166_v0, 4  ;;  %v327_v11 = vrot.slane %v1433_v1, 4 }
  0x23   : > { %182 = vrot.lane.b32.xlu2 %v166_v0, %s1332_s27  ;;  %s1334_s20 = smov 118   ;;  %s1335_s29 = smov 116   ;;  %v218_v9 = vunpack.c.l.s4 %v1337_v8  ;;  %v1338_v26 = vmov 1934713408   ;;  %vm1029_vm1 = vcmask 64512  }
  0x24   : > { %s1336_s30 = smov 114   ;;  %v266_v27 = vunpack.c.l.s4 %v1338_v26  ;;  %s1142_s2 = sshll.u32 %s1310_s9, 2 }
  0x25   : > { %v1451_v15 = vunpack.c.0.s8 %v218_v9  ;;  %p157_p0 = scmp.lt.s32.totalorder %s1314_s10, 1  ;;  %p159_p1 = scmp.lt.s32.totalorder %s1142_s2, 15 }
  0x26   : > { %v1484_v41 = vunpack.c.0.s8 %v266_v27 }
  0x27   : > { %s1664_s10 = smov (!%p157_p0, %s1314_s10), 1  ;;  %s1666_s2 = smov (!%p159_p1, %s1142_s2), 15 }
  0x28   : > { %s1143_s9 = sshll.u32 %s1664_s10, 4 }
  0x29   : > { %s162_s3 = sadd.s32 %s1143_s9, %s1666_s2 }
  0x2a   : > { %178 = vrot.lane.b32.xlu1 %v1433_v1, %s1330_s19  ;;  %172 = vrot.lane.b32.xlu0 %v1433_v1, %s1331_s23  ;;  %s1144_s10 = sshll.u32 %s162_s3, 3 }
  0x2b   : > { %184 = vrot.lane.b32.xlu2 %v1433_v1, %s1332_s27  ;;  %s164_s6 = scalar_lea.vmem %s1647_s1, %s1144_s10 }
  0x32   : > { %190 = vrot.lane.b32.xlu1 %v1433_v1, %s1333_s28  ;;  %188 = vrot.lane.b32.xlu0 %v166_v0, %s1333_s28 }
  0x33   : > { %194 = vrot.lane.b32.xlu2 %v166_v0, %s1334_s20 }
  0x3a   : > { %200 = vrot.lane.b32.xlu1 %v166_v0, %s1335_s29  ;;  %196 = vrot.lane.b32.xlu0 %v1433_v1, %s1334_s20 }
  0x3b   : > { %202 = vrot.lane.b32.xlu2 %v1433_v1, %s1335_s29 }
  0x42   : > { %208 = vrot.lane.b32.xlu1 %v1433_v1, %s1336_s30  ;;  %206 = vrot.lane.b32.xlu0 %v166_v0, %s1336_s30 }
  0x7d   : > { %v183_v2 = vpop.permute.xlu2 %182 }
  0x7e   : > { %v225_v14 = vrot.slane %v183_v2, 4 }
  0x85   : > { %v1446_v7 = vpop.permute.xlu2 %184 }
  0x8d   : > { %v195_v16 = vpop.permute.xlu2 %194 }
  0x8e   : > { %v251_v46 = vrot.slane %v195_v16, 4 }
  0x94   : > { %v177_v3 = vpop.permute.xlu1 %176  ;;  %v171_v4 = vpop.permute.xlu0 %170 }
  0x95   : > { %v216_v17 = vsel %vm213_vm0, %v177_v3, %v215_v10  ;;  %v227_v18 = vrot.slane %v171_v4, 4  ;;  %v212_v21 = vrot.slane %v177_v3, 4  ;;  %v226_v23 = vsel %vm213_vm0, %v225_v14, %v171_v4  ;;  %v1482_v40 = vpop.permute.xlu2 %202 }
  0x96   : > { %v1458_v22 = vperm.slane %v216_v17, %v1451_v15  ;;  %v1466_v28 = vperm.slane %v226_v23, %v1451_v15 }
  0x97   : > { %v228_v24 = vsel %vm213_vm0, %v183_v2, %v227_v18  ;;  %v214_v33 = vsel %vm213_vm0, %v212_v21, %v166_v0  ;;  %v337_v21 = vrot.slane %v1446_v7, 4 }
  0x98   : > { %v275_v34 = vrot.slane %v1458_v22, 4  ;;  %v1476_v35 = vperm.slane %v228_v24, %v1451_v15  ;;  %v220_v42 = vperm.slane %v214_v33, %v1451_v15  ;;  %v261_v43 = vrot.slane %v1466_v28, 4 }
  0x9a   : > { %v276_v47 = vsel %vm213_vm0, %v1476_v35, %v275_v34  ;;  %v262_v56 = vsel %vm213_vm0, %v261_v43, %v220_v42 }
  0x9b   : > { %v1500_v55 = vperm.slane %v276_v47, %v1484_v41  ;;  %v268_v9 = vperm.slane %v262_v56, %v1484_v41 }
  0x9c   : > { %v1442_v5 = vpop.permute.xlu1 %178  ;;  %v1444_v6 = vpop.permute.xlu0 %172 }
  0x9d   : > { %v328_v19 = vsel %vm213_vm0, %v1442_v5, %v327_v11  ;;  %v339_v20 = vrot.slane %v1444_v6, 4  ;;  %v323_v14 = vrot.slane %v1500_v55, 4  ;;  %v311_v34 = vrot.slane %v268_v9, 4 }
  0x9e   : > { %v1463_v25 = vperm.slane %v328_v19, %v1451_v15  ;;  %v325_v43 = vrot.slane %v1442_v5, 4 }
  0x9f   : > { %v340_v29 = vsel %vm213_vm0, %v1446_v7, %v339_v20  ;;  %v263_v20 = vrot.slane %v220_v42, 4  ;;  %v273_v7 = vrot.slane %v1476_v35, 4 }
  0xa0   : > { %v387_v38 = vrot.slane %v1463_v25, 4  ;;  %v1480_v39 = vperm.slane %v340_v29, %v1451_v15 }
  0xa2   : > { %v388_v52 = vsel %vm213_vm0, %v1480_v39, %v387_v38  ;;  %v264_v38 = vsel %vm213_vm0, %v1466_v28, %v263_v20  ;;  %v274_v28 = vsel %vm213_vm0, %v273_v7, %v1458_v22  ;;  %v385_v5 = vrot.slane %v1480_v39, 4 }
  0xa3   : > { %v1509_v63 = vperm.slane %v388_v52, %v1484_v41  ;;  %v326_v52 = vsel %vm213_vm0, %v325_v43, %v1433_v1  ;;  %v280_v22 = vperm.slane %v274_v28, %v1484_v41 }
  0xa4   : > { %v1449_v12 = vpop.permute.xlu1 %190  ;;  %v189_v13 = vpop.permute.xlu0 %188  ;;  %v332_v39 = vperm.slane %v326_v52, %v1451_v15  ;;  %v386_v1 = vsel %vm213_vm0, %v385_v5, %v1463_v25 }
  0xa5   : > { %v351_v30 = vrot.slane %v1449_v12, 4  ;;  %v239_v36 = vrot.slane %v189_v13, 4  ;;  %v435_v19 = vrot.slane %v1509_v63, 4 }
  0xa7   : > { %v352_v44 = vsel %vm213_vm0, %v1482_v40, %v351_v30 }
  0xa8   : > { %v360_v49 = vperm.slane %v352_v44, %v1451_v15  ;;  %v338_v44 = vsel %vm213_vm0, %v337_v21, %v1444_v6 }
  0xaa   : > { %v411_v0 = vrot.slane %v360_v49, 4 }
  0xac   : > { %v201_v31 = vpop.permute.xlu1 %200  ;;  %v1471_v32 = vpop.permute.xlu0 %196 }
  0xad   : > { %v237_v37 = vrot.slane %v201_v31, 4  ;;  %v240_v45 = vsel %vm213_vm0, %v201_v31, %v239_v36  ;;  %v363_v51 = vrot.slane %v1471_v32, 4 }
  0xae   : > { %v248_v50 = vperm.slane %v240_v45, %v1451_v15 }
  0xaf   : > { %v238_v48 = vsel %vm213_vm0, %v237_v37, %v189_v13 }
  0xb0   : > { %v244_v57 = vperm.slane %v238_v48, %v1451_v15  ;;  %v299_v2 = vrot.slane %v248_v50, 4  ;;  %v272_v48 = vperm.slane %v264_v38, %v1484_v41 }
  0xb2   : > { %v287_v10 = vrot.slane %v244_v57, 4 }
  0xb4   : > { %v209_v53 = vpop.permute.xlu1 %208  ;;  %v207_v54 = vpop.permute.xlu0 %206 }
  0xb5   : > { %v364_v58 = vsel %vm213_vm0, %v209_v53, %v363_v51  ;;  %v249_v59 = vrot.slane %v207_v54, 4  ;;  %v252_v60 = vsel %vm213_vm0, %v207_v54, %v251_v46  ;;  %v361_v36 = vrot.slane %v209_v53, 4 }
  0xb6   : > { %v372_v61 = vperm.slane %v364_v58, %v1451_v15  ;;  %v260_v62 = vperm.slane %v252_v60, %v1451_v15  ;;  %v349_v51 = vrot.slane %v1482_v40, 4  ;;  %v392_v60 = vperm.slane %v386_v1, %v1484_v41 }
  0xb7   : > { %v250_v3 = vsel %vm213_vm0, %v249_v59, %v195_v16  ;;  %v362_v35 = vsel %vm213_vm0, %v361_v36, %v1471_v32 }
  0xb8   : > { %v256_v4 = vperm.slane %v250_v3, %v1451_v15  ;;  %v297_v8 = vrot.slane %v260_v62, 4  ;;  %v412_v11 = vsel %vm213_vm0, %v372_v61, %v411_v0  ;;  %v300_v13 = vsel %vm213_vm0, %v260_v62, %v299_v2 }
  0xb9   : > { %v1518_v18 = vperm.slane %v412_v11, %v1484_v41  ;;  %v308_v16 = vperm.slane %v300_v13, %v1484_v41  ;;  %v409_v31 = vrot.slane %v372_v61, 4  ;;  %v368_v54 = vperm.slane %v362_v35, %v1451_v15 }
  0xba   : > { %v285_v17 = vrot.slane %v256_v4, 4  ;;  %v288_v23 = vsel %vm213_vm0, %v256_v4, %v287_v10  ;;  %v298_v24 = vsel %vm213_vm0, %v297_v8, %v248_v50  ;;  %v344_v50 = vperm.slane %v338_v44, %v1451_v15 }
  0xbb   : > { %v436_v26 = vsel %vm213_vm0, %v1518_v18, %v435_v19  ;;  %v324_v27 = vsel %vm213_vm0, %v308_v16, %v323_v14  ;;  %v296_v30 = vperm.slane %v288_v23, %v1484_v41  ;;  %v304_v42 = vperm.slane %v298_v24, %v1484_v41 }
  0xbc   : > { %v286_v29 = vsel %vm213_vm0, %v285_v17, %v244_v57  ;;  %917 = vxpose.xlu1.b32.start.end [1/1] (short) (narrow) %v436_v26, 8  ;;  %661 = vxpose.xlu2.b32.start.end [1/1] (short) (narrow) %v324_v27, 8  ;;  %v410_v47 = vsel %vm213_vm0, %v409_v31, %v360_v49  ;;  %v373_v56 = vrot.slane %v344_v50, 4  ;;  %v350_v57 = vsel %vm213_vm0, %v349_v51, %v1449_v12 }
  0xbd   : > { %v292_v33 = vperm.slane %v286_v29, %v1484_v41  ;;  %v313_v45 = vrot.slane %v296_v30, 4  ;;  %v317_v6 = vrot.slane %v304_v42, 4  ;;  %v416_v32 = vperm.slane %v410_v47, %v1484_v41 }
  0xbe   : > { %v397_v59 = vrot.slane %v368_v54, 4  ;;  %v315_v61 = vrot.slane %v272_v48, 4  ;;  %v356_v62 = vperm.slane %v350_v57, %v1451_v15  ;;  %v321_v0 = vrot.slane %v308_v16, 4 }
  0xbf   : > { %v312_v37 = vsel %vm213_vm0, %v292_v33, %v311_v34  ;;  %v309_v46 = vrot.slane %v292_v33, 4  ;;  %v314_v49 = vsel %vm213_vm0, %v313_v45, %v272_v48  ;;  %v318_v40 = vsel %vm213_vm0, %v317_v6, %v280_v22 }
  0xc0   : > { %469 = vxpose.xlu0.b32.start.end [1/1] (short) (narrow) %v312_v37, 8  ;;  %v429_v58 = vrot.slane %v416_v32, 4  ;;  %v374_v2 = vsel %vm213_vm0, %v373_v56, %v332_v39  ;;  %v316_v4 = vsel %vm213_vm0, %v296_v30, %v315_v61  ;;  %v398_v25 = vsel %vm213_vm0, %v397_v59, %v356_v62 }
  0xc1   : > { %v310_v53 = vsel %vm213_vm0, %v309_v46, %v268_v9  ;;  %v380_v12 = vperm.slane %v374_v2, %v1484_v41  ;;  %v399_v8 = vrot.slane %v356_v62, 4  ;;  %v322_v9 = vsel %vm213_vm0, %v321_v0, %v1500_v55 }
  0xc2   : > { %v430_v3 = vsel %vm213_vm0, %v429_v58, %v392_v60  ;;  %v404_v10 = vperm.slane %v398_v25, %v1484_v41  ;;  %v375_v13 = vrot.slane %v332_v39, 4  ;;  %v319_v17 = vrot.slane %v280_v22, 4 }
  0xc3   : > { %v400_v11 = vsel %vm213_vm0, %v368_v54, %v399_v8  ;;  %v423_v14 = vrot.slane %v380_v12, 4  ;;  %v433_v19 = vrot.slane %v1518_v18, 4  ;;  %v431_v30 = vrot.slane %v392_v60, 4 }
  0xc4   : > { %501 = vxpose.xlu1.b32.start.end [1/1] (short) (narrow) %v314_v49, 8  ;;  %437 = vxpose.xlu2.b32.start.end [1/1] (short) (narrow) %v310_v53, 8  ;;  %v320_v20 = vsel %vm213_vm0, %v304_v42, %v319_v17  ;;  %v408_v21 = vperm.slane %v400_v11, %v1484_v41  ;;  %v376_v55 = vsel %vm213_vm0, %v344_v50, %v375_v13  ;;  %v421_v31 = vrot.slane %v404_v10, 4 }
  0xc5   : > { %v424_v16 = vsel %vm213_vm0, %v404_v10, %v423_v14  ;;  %v434_v23 = vsel %vm213_vm0, %v433_v19, %v1509_v63  ;;  %v384_v26 = vperm.slane %v376_v55, %v1484_v41  ;;  %v432_v33 = vsel %vm213_vm0, %v416_v32, %v431_v30 }
  0xc6   : > { %v425_v24 = vrot.slane %v408_v21, 4  ;;  %v422_v34 = vsel %vm213_vm0, %v421_v31, %v380_v12 }
  0xc7   : > { %v427_v18 = vrot.slane %v384_v26, 4 }
  0xc8   : > { %565 = vxpose.xlu0.b32.start.end [1/1] (short) (narrow) %v318_v40, 8  ;;  %v426_v27 = vsel %vm213_vm0, %v425_v24, %v384_v26 }
  0xc9   : > { %v428_v29 = vsel %vm213_vm0, %v408_v21, %v427_v18 }
  0xcc   : > { %821 = vxpose.xlu1.b32.start.end [1/1] (short) (narrow) %v430_v3, 8  ;;  %533 = vxpose.xlu2.b32.start.end [1/1] (short) (narrow) %v316_v4, 8 }
  0xd0   : > { %629 = vxpose.xlu0.b32.start.end [1/1] (short) (narrow) %v322_v9, 8 }
  0xd4   : > { %725 = vxpose.xlu1.b32.start.end [1/1] (short) (narrow) %v424_v16, 8  ;;  %597 = vxpose.xlu2.b32.start.end [1/1] (short) (narrow) %v320_v20, 8 }
  0xd8   : > { %885 = vxpose.xlu0.b32.start.end [1/1] (short) (narrow) %v434_v23, 8 }
  0xdc   : > { %757 = vxpose.xlu2.b32.start.end [1/1] (short) (narrow) %v426_v27, 8 }
  0xe0   : > { %789 = vxpose.xlu0.b32.start.end [1/1] (short) (narrow) %v428_v29, 8 }
  0xe4   : > { %853 = vxpose.xlu2.b32.start.end [1/1] (short) (narrow) %v432_v33, 8 }
  0xe8   : > { %693 = vxpose.xlu0.b32.start.end [1/1] (short) (narrow) %v422_v34, 8 }
 0x155   : > { %v677_v63 = vpop.trf.xlu2 }
 0x156   : > { %v995_v35 = vrot.slane %v677_v63, 4 }
 0x15d   : > { %v453_v7 = vpop.trf.xlu2 }
 0x160   : > { %v933_v36 = vpop.trf.xlu1 }
 0x161   : > { %v1007_v40 = vrot.slane %v933_v36, 4 }
 0x164   : > { %v485_v37 = vpop.trf.xlu0 }
 0x165   : > { %v549_v38 = vpop.trf.xlu2 }
 0x166   : > { %v996_v28 = vsel %vm213_vm0, %v995_v35, %v549_v38 }
 0x167   : > { %v1000_v6 = vperm.slane %v996_v28, %v1451_v15 }
 0x168   : > { %v517_v43 = vpop.trf.xlu1 }
 0x169   : > { %v1013_v39 = vrot.slane %v1000_v6, 4 }
 0x16c   : > { %v581_v42 = vpop.trf.xlu0 }
 0x16d   : > { %v613_v44 = vpop.trf.xlu2  ;;  %v949_v22 = vrot.slane %v581_v42, 4 }
 0x16e   : > { %v989_v48 = vrot.slane %v613_v44, 4 }
 0x16f   : > { %v950_v60 = vsel %vm213_vm0, %v949_v22, %v453_v7 }
 0x170   : > { %v837_v47 = vpop.trf.xlu1  ;;  %v990_v51 = vsel %vm213_vm0, %v989_v48, %v485_v37  ;;  %v954_v25 = vperm.slane %v950_v60, %v1451_v15 }
 0x171   : > { %v994_v32 = vperm.slane %v990_v51, %v1451_v15  ;;  %v961_v13 = vrot.slane %v837_v47, 4 }
 0x173   : > { %v1014_v58 = vsel %vm213_vm0, %v1013_v39, %v994_v32 }
 0x174   : > { %v645_v45 = vpop.trf.xlu0  ;;  %v1018_v3 = vperm.slane %v1014_v58, %v1484_v41 }
 0x175   : > { %v773_v46 = vpop.trf.xlu2  ;;  %v955_v50 = vrot.slane %v645_v45, 4 }
 0x176   : > { %v1027_v11 = vrot.slane %v1018_v3, 4 }
 0x177   : > { %v956_v49 = vsel %vm213_vm0, %v955_v50, %v517_v43 }
 0x178   : > { %v741_v54 = vpop.trf.xlu1  ;;  %v960_v56 = vperm.slane %v956_v49, %v1451_v15 }
 0x17a   : > { %v973_v62 = vrot.slane %v960_v56, 4 }
 0x17c   : > { %v901_v5 = vpop.trf.xlu0  ;;  %v974_v8 = vsel %vm213_vm0, %v973_v62, %v954_v25 }
 0x17d   : > { %v869_v52 = vpop.trf.xlu2  ;;  %v967_v1 = vrot.slane %v901_v5, 4  ;;  %v978_v19 = vperm.slane %v974_v8, %v1484_v41 }
 0x17e   : > { %v1001_v53 = vrot.slane %v869_v52, 4 }
 0x17f   : > { %v968_v4 = vsel %vm213_vm0, %v967_v1, %v773_v46  ;;  %v987_v27 = vrot.slane %v978_v19, 4 }
 0x180   : > { %v1002_v57 = vsel %vm213_vm0, %v1001_v53, %v741_v54  ;;  %v972_v9 = vperm.slane %v968_v4, %v1451_v15 }
 0x181   : > { %v1006_v2 = vperm.slane %v1002_v57, %v1451_v15 }
 0x182   : > { %v979_v55 = vrot.slane %v972_v9, 4 }
 0x184   : > { %v805_v59 = vpop.trf.xlu0 }
 0x185   : > { %v1008_v61 = vsel %vm213_vm0, %v1007_v40, %v805_v59 }
 0x186   : > { %v1012_v0 = vperm.slane %v1008_v61, %v1451_v15 }
 0x188   : > { %v1019_v12 = vrot.slane %v1012_v0, 4 }
 0x18a   : > { %v1020_v10 = vsel %vm213_vm0, %v1019_v12, %v1006_v2 }
 0x18b   : > { %v1024_v14 = vperm.slane %v1020_v10, %v1484_v41 }
 0x18c   : > { %v709_v17 = vpop.trf.xlu0 }
 0x18d   : > { %v1025_v16 = vrot.slane %v1024_v14, 4  ;;  %v1028_v20 = vsel %vm213_vm0, %v1024_v14, %v1027_v11  ;;  %v962_v21 = vsel %vm213_vm0, %v961_v13, %v709_v17 }
 0x18e   : > { %1033 = vst.msk [vmem:[%s164_s6 + $0x18] sm:$0xff] %vm1029_vm1, %v1028_v20  ;;  %v966_v23 = vperm.slane %v962_v21, %v1451_v15 }
 0x18f   : > { %v1026_v24 = vsel %vm213_vm0, %v1025_v16, %v1018_v3 }
 0x190   : > { %1032 = vst.msk [vmem:[%s164_s6 + $0x10] sm:$0xff] %vm1029_vm1, %v1026_v24  ;;  %v980_v26 = vsel %vm213_vm0, %v979_v55, %v966_v23 }
 0x191   : > { %v984_v18 = vperm.slane %v980_v26, %v1484_v41 }
 0x193   : > { %v985_v29 = vrot.slane %v984_v18, 4  ;;  %v988_v30 = vsel %vm213_vm0, %v984_v18, %v987_v27 }
 0x194   : > { %1031 = vst.msk [vmem:[%s164_s6 + $0x8] sm:$0xff] %vm1029_vm1, %v988_v30 }
 0x195   : > { %v986_v31 = vsel %vm213_vm0, %v985_v29, %v978_v19 }
 0x196   : > { %1030 = vst.msk [vmem:[%s164_s6] sm:$0xff] %vm1029_vm1, %v986_v31 }
 0x197 PF: > { %s14_s13 = sadd.s32 1, %s1326_s13   ;;  %s1650_s6 = smov %s1302_s7 }
 0x198   : > { %p11_p2 = scmp.ge.s32.totalorder %s14_s13, 10   ;;  %s1651_s7 = smov %s1306_s8 }
 0x199   : > { %s1652_s8 = smov %s1416_s26  ;;  %s1653_s9 = smov %s1318_s11 }
 0x19a   : > { %s1654_s10 = smov %s1322_s12  ;;  %s1655_s11 = smov %s1658_s15 }
 0x19b   : > { %s1656_s12 = smov %s1662_s16  ;;  %13 = sbr.rel (!%p11_p2) target bundleno = 5 (0x5), region = 64 }
 0x1a0   :  { %1064 = vsyncpa [#allocation3], 1 }
 0x1a1   :  { %1066 = vsyncpa [#allocation3 + $0x1], 1 }

</bundles_post_ra>
